<compile_context>
chip_gen: v7x
topology: tpu7x:2x2x1
jax: 0.10.0
libtpu: 0.0.40
codegen_flags: <defaults>
</compile_context>

<pallas_src>
import math
import functools

import jax
import jax.numpy as jnp
from jax.experimental import pallas as pl
from jax.experimental.pallas import tpu as pltpu


# ------------------------------ Pallas kernel -------------------------------

def _upsample_kernel(xp_ref, w_ref, b_ref, o_ref, *, H, W, Cin):
    # xp_ref: (1, H+2, W+2, Cin)  bf16  zero-padded NHWC input image
    # w_ref:  (9*Cin, Nout)       bf16  fused 3x3 subpixel weight matrix
    # b_ref:  (1, Nout)           f32   per-(subpixel, cout) bias
    # o_ref:  (1, H, W, Nout)     bf16  Nout = 4*Cout padded to a 128 multiple
    n_out = o_ref.shape[-1]

    def tap_dot(idx):
        dh, dw = divmod(idx, 3)
        tap = xp_ref[0, dh:dh + H, dw:dw + W, :].reshape(H * W, Cin)
        return jnp.dot(tap, w_ref[idx * Cin:(idx + 1) * Cin, :],
                       preferred_element_type=jnp.float32)

    # Bias folded into the first accumulated tap (broadcast add), f32 accumulation.
    acc = tap_dot(0) + b_ref[...]
    for idx in range(1, 9):
        acc = acc + tap_dot(idx)

    o_ref[0] = acc.reshape(H, W, n_out).astype(o_ref.dtype)


# ---------------------- weight transform (subpixel form) --------------------

def _subpixel_weight(w_t, bias, n_pad):
    """w_t: (Cin, Cout, 4, 4) PyTorch ConvTranspose2d weight; bias: (Cout,).

    Returns W_mat (9*Cin, n_pad) with rows ordered (dh, dw, cin) over a 3x3 window of
    the +1-padded input and columns ordered (a, b, cout) over the 2x2 output subpixels,
    plus the matching bias row.  Derivation: oh = 2r + a, ih = (oh + 1 - kh)/2  =>
    tap (dh, dw) of padded input uses kernel index kh = a + 3 - 2*dh (when in range).
    """
    Cin, Cout = w_t.shape[0], w_t.shape[1]
    wt = jnp.transpose(w_t, (2, 3, 0, 1))                     # (kh, kw, Cin, Cout)
    zeros = jnp.zeros((Cin, Cout), w_t.dtype)

    def tap(a, b, dh, dw):
        kh = a + 3 - 2 * dh
        kw = b + 3 - 2 * dw
        if 0 <= kh < 4 and 0 <= kw < 4:
            return wt[kh, kw]
        return zeros

    rows = []
    for dh in range(3):
        for dw in range(3):
            rows.append(jnp.concatenate(
                [tap(a, b, dh, dw) for a in range(2) for b in range(2)], axis=1))
    w_mat = jnp.concatenate(rows, axis=0)                     # (9*Cin, 4*Cout)
    b_vec = jnp.tile(bias, 4)                                 # (4*Cout,) in (a,b,cout) order
    pad = n_pad - 4 * Cout
    if pad:
        w_mat = jnp.pad(w_mat, ((0, 0), (0, pad)))
        b_vec = jnp.pad(b_vec, (0, pad))
    return w_mat, b_vec.reshape(1, n_pad)


def _interleave_subpixels(y, n, h, w, cout):
    """y: (n, h, w, 4*cout) with last dim in (a, b, cout) order -> (n, cout, 2h, 2w).

    Single fused transpose: (n,h,w,a,b,co) -> (n,co,h,a,w,b) -> reshape; output
    row = 2r + a, col = 2c + b (matches the subpixel weight derivation).
    """
    y = y.reshape(n, h, w, 2, 2, cout)
    y = jnp.transpose(y, (0, 5, 1, 3, 2, 4))
    return y.reshape(n, cout, 2 * h, 2 * w)


# --------------------------------- Forward ----------------------------------

def upsample_forward(params, x_nchw, t):
    _ = t                                   # UpSample.forward ignores t
    w_t, bias = params['up_w'], params['up_b']
    Cin, Cout = w_t.shape[0], w_t.shape[1]
    N, C, H, W = x_nchw.shape
    assert C == Cin
    n_pad = max(128, ((4 * Cout + 127) // 128) * 128)         # lane-dense output width

    # Cast to bf16 FIRST so the NCHW->NHWC transpose and spatial pad move half the
    # bytes.  Channels land on the lane axis (lane-sparse at Cin=32 -- acceptable,
    # the kernel re-reads each tap straight from the single VMEM block).
    x_bf16 = x_nchw.astype(jnp.bfloat16)
    x_nhwc = jnp.transpose(x_bf16, (0, 2, 3, 1))
    xp = jnp.pad(x_nhwc, ((0, 0), (1, 1), (1, 1), (0, 0)))

    w_mat, b_vec = _subpixel_weight(w_t, bias, n_pad)
    w_mat = w_mat.astype(jnp.bfloat16)
    b_vec = b_vec.astype(jnp.float32)

    kernel = functools.partial(_upsample_kernel, H=H, W=W, Cin=Cin)
    out = pl.pallas_call(
        kernel,
        out_shape=jax.ShapeDtypeStruct((N, H, W, n_pad), jnp.bfloat16),
        grid=(N,),
        in_specs=[
            pl.BlockSpec((1, H + 2, W + 2, Cin), lambda n: (n, 0, 0, 0)),
            pl.BlockSpec((9 * Cin, n_pad), lambda n: (0, 0)),
            pl.BlockSpec((1, n_pad), lambda n: (0, 0)),
        ],
        out_specs=pl.BlockSpec((1, H, W, n_pad), lambda n: (n, 0, 0, 0)),
        compiler_params=pltpu.CompilerParams(dimension_semantics=("parallel",)),
    )(xp, w_mat, b_vec)

    # Single fused interleave + NCHW pass; upcast to f32 fused into the same pass
    # to keep the PyTorch module's output dtype.
    out = _interleave_subpixels(out[..., :4 * Cout], N, H, W, Cout)
    return out.astype(jnp.float32)


# --------------- pure-JAX f32 check of the subpixel decomposition -----------

def _subpixel_reference_f32(params, x_nchw):
    """Evaluates the same subpixel weight matrix + interleave in exact f32 (no Pallas).

    Guards the _subpixel_weight derivation and the (a, b, cout) interleave ordering
    with a tight tolerance, independent of bf16 quantization in the fast path.
    """
    w_t, bias = params['up_w'], params['up_b']
    Cin, Cout = w_t.shape[0], w_t.shape[1]
    N, _, H, W = x_nchw.shape
    n_pad = max(128, ((4 * Cout + 127) // 128) * 128)
    w_mat, b_vec = _subpixel_weight(w_t, bias, n_pad)
    xp = jnp.pad(jnp.transpose(x_nchw, (0, 2, 3, 1)), ((0, 0), (1, 1), (1, 1), (0, 0)))
    cols = [xp[:, dh:dh + H, dw:dw + W, :] for dh in range(3) for dw in range(3)]
    patch = jnp.concatenate(cols, axis=-1).reshape(N, H * W, 9 * Cin)
    y = jnp.einsum('nmk,kc->nmc', patch, w_mat,
                   precision=jax.lax.Precision.HIGHEST) + b_vec
    y = y.reshape(N, H, W, n_pad)[..., :4 * Cout]
    return _interleave_subpixels(y, N, H, W, Cout)


# ----------------------------- Parameter init -------------------------------

def init_upsample(key, n_channels):
    k1, k2 = jax.random.split(key)
    # PyTorch ConvTranspose2d default init: fan_in = weight.size(1) * kh * kw.
    bound = 1.0 / math.sqrt(n_channels * 4 * 4)
    w = jax.random.uniform(k1, (n_channels, n_channels, 4, 4), jnp.float32, -bound, bound)
    b = jax.random.uniform(k2, (n_channels,), jnp.float32, -bound, bound)
    return {'up_w': w, 'up_b': b}


# ----------------------------------- Main ------------------------------------

if __name__ == "__main__":
    key = jax.random.PRNGKey(0)
    k_p, k_x, k_t = jax.random.split(key, 3)

    n_channels, B, H, W = 32, 2, 16, 16
    params = init_upsample(k_p, n_channels)
    x = jax.random.normal(k_x, (B, n_channels, H, W), jnp.float32)
    t = jax.random.normal(k_t, (B, n_channels * 4), jnp.float32)   # ignored by UpSample

    fwd = jax.jit(lambda a, b: upsample_forward(params, a, b))
    out = jax.block_until_ready(fwd(x, t))

    assert out.shape == (B, n_channels, 2 * H, 2 * W), out.shape
    assert bool(jnp.all(jnp.isfinite(out)))

    # Exact-precision reference: ConvTranspose2d(4,4,s=2,p=1) == conv of the 2x-dilated
    # lhs with the spatially flipped / channel-swapped kernel, pad = k-1-p = 2.
    w_conv = jnp.transpose(params['up_w'][:, :, ::-1, ::-1], (1, 0, 2, 3))
    ref = jax.lax.conv_general_dilated(
        x, w_conv, window_strides=(1, 1), padding=((2, 2), (2, 2)),
        lhs_dilation=(2, 2), dimension_numbers=('NCHW', 'OIHW', 'NCHW'),
        precision=jax.lax.Precision.HIGHEST,
    ) + params['up_b'][None, :, None, None]

    # Tight f32 guard on the subpixel weight transform + interleave ordering.
    chk = jax.block_until_ready(jax.jit(_subpixel_reference_f32)(params, x))
    err_f32 = float(jnp.max(jnp.abs(chk - ref)))
    assert err_f32 < 1e-3, f"subpixel-transform f32 max abs err {err_f32}"

    # bf16 fast path (bf16 inputs, f32 accumulation, bf16 writeback): loose tolerance.
    err_bf16 = float(jnp.max(jnp.abs(out - ref)))
    assert err_bf16 < 1e-1, f"bf16 kernel path max abs err {err_bf16}"

    print("KERNEL_OK")
</pallas_src>

<mosaic_0001>
module attributes {stable_mosaic.version = 11 : i64} {
  func.func @_upsample_kernel(%arg0: i32, %arg1: memref<1x18x18x32xbf16, #tpu.memory_space<vmem>>, %arg2: memref<288x128xbf16, #tpu.memory_space<vmem>>, %arg3: memref<1x128xf32, #tpu.memory_space<vmem>>, %arg4: memref<1x16x16x128xbf16, #tpu.memory_space<vmem>>) attributes {dimension_semantics = [#tpu.dimension_semantics<parallel>], iteration_bounds = array<i64: 2>, scalar_prefetch = 0 : i64, scratch_operands = 0 : i64, tpu.core_type = #tpu.core_type<tc>, window_params = [{transform_indices = @transform_0, window_bounds = array<i64: 1, 18, 18, 32>}, {pipeline_mode = #tpu.pipeline_mode<synchronous>, transform_indices = @transform_1, window_bounds = array<i64: 288, 128>}, {pipeline_mode = #tpu.pipeline_mode<synchronous>, transform_indices = @transform_2, window_bounds = array<i64: 1, 128>}, {transform_indices = @transform_3, window_bounds = array<i64: 1, 16, 16, 128>}]} {
    %c0 = arith.constant 0 : index
    %c0_0 = arith.constant 0 : index
    %c0_1 = arith.constant 0 : index
    %c0_2 = arith.constant 0 : index
    %0 = vector.load %arg1[%c0, %c0_0, %c0_1, %c0_2] : memref<1x18x18x32xbf16, #tpu.memory_space<vmem>>, vector<1x16x16x32xbf16>
    %1 = vector.shape_cast %0 : vector<1x16x16x32xbf16> to vector<16x16x32xbf16>
    %2 = vector.shape_cast %1 : vector<16x16x32xbf16> to vector<256x32xbf16>
    %c0_3 = arith.constant 0 : index
    %c0_4 = arith.constant 0 : index
    %3 = vector.load %arg2[%c0_3, %c0_4] : memref<288x128xbf16, #tpu.memory_space<vmem>>, vector<32x128xbf16>
    %cst = arith.constant dense<0.000000e+00> : vector<256x128xf32>
    %4 = tpu.matmul %2, %3, %cst {dimension_numbers = #tpu.dot_dimension_numbers<[1], [0], [0], [1], [0, 0, 1, 1], [], []>} : vector<256x32xbf16>, vector<32x128xbf16>, vector<256x128xf32> -> vector<256x128xf32>
    %c0_5 = arith.constant 0 : index
    %c0_6 = arith.constant 0 : index
    %5 = vector.load %arg3[%c0_5, %c0_6] : memref<1x128xf32, #tpu.memory_space<vmem>>, vector<1x128xf32>
    %6 = vector.broadcast %5 : vector<1x128xf32> to vector<256x128xf32>
    %7 = arith.addf %4, %6 : vector<256x128xf32>
    %c0_7 = arith.constant 0 : index
    %c0_8 = arith.constant 0 : index
    %c1 = arith.constant 1 : index
    %c0_9 = arith.constant 0 : index
    %8 = vector.load %arg1[%c0_7, %c0_8, %c1, %c0_9] : memref<1x18x18x32xbf16, #tpu.memory_space<vmem>>, vector<1x16x16x32xbf16>
    %9 = vector.shape_cast %8 : vector<1x16x16x32xbf16> to vector<16x16x32xbf16>
    %10 = vector.shape_cast %9 : vector<16x16x32xbf16> to vector<256x32xbf16>
    %c32 = arith.constant 32 : index
    %c0_10 = arith.constant 0 : index
    %11 = vector.load %arg2[%c32, %c0_10] : memref<288x128xbf16, #tpu.memory_space<vmem>>, vector<32x128xbf16>
    %cst_11 = arith.constant dense<0.000000e+00> : vector<256x128xf32>
    %12 = tpu.matmul %10, %11, %cst_11 {dimension_numbers = #tpu.dot_dimension_numbers<[1], [0], [0], [1], [0, 0, 1, 1], [], []>} : vector<256x32xbf16>, vector<32x128xbf16>, vector<256x128xf32> -> vector<256x128xf32>
    %13 = arith.addf %7, %12 : vector<256x128xf32>
    %c0_12 = arith.constant 0 : index
    %c0_13 = arith.constant 0 : index
    %c2 = arith.constant 2 : index
    %c0_14 = arith.constant 0 : index
    %14 = vector.load %arg1[%c0_12, %c0_13, %c2, %c0_14] : memref<1x18x18x32xbf16, #tpu.memory_space<vmem>>, vector<1x16x16x32xbf16>
    %15 = vector.shape_cast %14 : vector<1x16x16x32xbf16> to vector<16x16x32xbf16>
    %16 = vector.shape_cast %15 : vector<16x16x32xbf16> to vector<256x32xbf16>
    %c64 = arith.constant 64 : index
    %c0_15 = arith.constant 0 : index
    %17 = vector.load %arg2[%c64, %c0_15] : memref<288x128xbf16, #tpu.memory_space<vmem>>, vector<32x128xbf16>
    %cst_16 = arith.constant dense<0.000000e+00> : vector<256x128xf32>
    %18 = tpu.matmul %16, %17, %cst_16 {dimension_numbers = #tpu.dot_dimension_numbers<[1], [0], [0], [1], [0, 0, 1, 1], [], []>} : vector<256x32xbf16>, vector<32x128xbf16>, vector<256x128xf32> -> vector<256x128xf32>
    %19 = arith.addf %13, %18 : vector<256x128xf32>
    %c0_17 = arith.constant 0 : index
    %c1_18 = arith.constant 1 : index
    %c0_19 = arith.constant 0 : index
    %c0_20 = arith.constant 0 : index
    %20 = vector.load %arg1[%c0_17, %c1_18, %c0_19, %c0_20] : memref<1x18x18x32xbf16, #tpu.memory_space<vmem>>, vector<1x16x16x32xbf16>
    %21 = vector.shape_cast %20 : vector<1x16x16x32xbf16> to vector<16x16x32xbf16>
    %22 = vector.shape_cast %21 : vector<16x16x32xbf16> to vector<256x32xbf16>
    %c96 = arith.constant 96 : index
    %c0_21 = arith.constant 0 : index
    %23 = vector.load %arg2[%c96, %c0_21] : memref<288x128xbf16, #tpu.memory_space<vmem>>, vector<32x128xbf16>
    %cst_22 = arith.constant dense<0.000000e+00> : vector<256x128xf32>
    %24 = tpu.matmul %22, %23, %cst_22 {dimension_numbers = #tpu.dot_dimension_numbers<[1], [0], [0], [1], [0, 0, 1, 1], [], []>} : vector<256x32xbf16>, vector<32x128xbf16>, vector<256x128xf32> -> vector<256x128xf32>
    %25 = arith.addf %19, %24 : vector<256x128xf32>
    %c0_23 = arith.constant 0 : index
    %c1_24 = arith.constant 1 : index
    %c1_25 = arith.constant 1 : index
    %c0_26 = arith.constant 0 : index
    %26 = vector.load %arg1[%c0_23, %c1_24, %c1_25, %c0_26] : memref<1x18x18x32xbf16, #tpu.memory_space<vmem>>, vector<1x16x16x32xbf16>
    %27 = vector.shape_cast %26 : vector<1x16x16x32xbf16> to vector<16x16x32xbf16>
    %28 = vector.shape_cast %27 : vector<16x16x32xbf16> to vector<256x32xbf16>
    %c128 = arith.constant 128 : index
    %c0_27 = arith.constant 0 : index
    %29 = vector.load %arg2[%c128, %c0_27] : memref<288x128xbf16, #tpu.memory_space<vmem>>, vector<32x128xbf16>
    %cst_28 = arith.constant dense<0.000000e+00> : vector<256x128xf32>
    %30 = tpu.matmul %28, %29, %cst_28 {dimension_numbers = #tpu.dot_dimension_numbers<[1], [0], [0], [1], [0, 0, 1, 1], [], []>} : vector<256x32xbf16>, vector<32x128xbf16>, vector<256x128xf32> -> vector<256x128xf32>
    %31 = arith.addf %25, %30 : vector<256x128xf32>
    %c0_29 = arith.constant 0 : index
    %c1_30 = arith.constant 1 : index
    %c2_31 = arith.constant 2 : index
    %c0_32 = arith.constant 0 : index
    %32 = vector.load %arg1[%c0_29, %c1_30, %c2_31, %c0_32] : memref<1x18x18x32xbf16, #tpu.memory_space<vmem>>, vector<1x16x16x32xbf16>
    %33 = vector.shape_cast %32 : vector<1x16x16x32xbf16> to vector<16x16x32xbf16>
    %34 = vector.shape_cast %33 : vector<16x16x32xbf16> to vector<256x32xbf16>
    %c160 = arith.constant 160 : index
    %c0_33 = arith.constant 0 : index
    %35 = vector.load %arg2[%c160, %c0_33] : memref<288x128xbf16, #tpu.memory_space<vmem>>, vector<32x128xbf16>
    %cst_34 = arith.constant dense<0.000000e+00> : vector<256x128xf32>
    %36 = tpu.matmul %34, %35, %cst_34 {dimension_numbers = #tpu.dot_dimension_numbers<[1], [0], [0], [1], [0, 0, 1, 1], [], []>} : vector<256x32xbf16>, vector<32x128xbf16>, vector<256x128xf32> -> vector<256x128xf32>
    %37 = arith.addf %31, %36 : vector<256x128xf32>
    %c0_35 = arith.constant 0 : index
    %c2_36 = arith.constant 2 : index
    %c0_37 = arith.constant 0 : index
    %c0_38 = arith.constant 0 : index
    %38 = vector.load %arg1[%c0_35, %c2_36, %c0_37, %c0_38] : memref<1x18x18x32xbf16, #tpu.memory_space<vmem>>, vector<1x16x16x32xbf16>
    %39 = vector.shape_cast %38 : vector<1x16x16x32xbf16> to vector<16x16x32xbf16>
    %40 = vector.shape_cast %39 : vector<16x16x32xbf16> to vector<256x32xbf16>
    %c192 = arith.constant 192 : index
    %c0_39 = arith.constant 0 : index
    %41 = vector.load %arg2[%c192, %c0_39] : memref<288x128xbf16, #tpu.memory_space<vmem>>, vector<32x128xbf16>
    %cst_40 = arith.constant dense<0.000000e+00> : vector<256x128xf32>
    %42 = tpu.matmul %40, %41, %cst_40 {dimension_numbers = #tpu.dot_dimension_numbers<[1], [0], [0], [1], [0, 0, 1, 1], [], []>} : vector<256x32xbf16>, vector<32x128xbf16>, vector<256x128xf32> -> vector<256x128xf32>
    %43 = arith.addf %37, %42 : vector<256x128xf32>
    %c0_41 = arith.constant 0 : index
    %c2_42 = arith.constant 2 : index
    %c1_43 = arith.constant 1 : index
    %c0_44 = arith.constant 0 : index
    %44 = vector.load %arg1[%c0_41, %c2_42, %c1_43, %c0_44] : memref<1x18x18x32xbf16, #tpu.memory_space<vmem>>, vector<1x16x16x32xbf16>
    %45 = vector.shape_cast %44 : vector<1x16x16x32xbf16> to vector<16x16x32xbf16>
    %46 = vector.shape_cast %45 : vector<16x16x32xbf16> to vector<256x32xbf16>
    %c224 = arith.constant 224 : index
    %c0_45 = arith.constant 0 : index
    %47 = vector.load %arg2[%c224, %c0_45] : memref<288x128xbf16, #tpu.memory_space<vmem>>, vector<32x128xbf16>
    %cst_46 = arith.constant dense<0.000000e+00> : vector<256x128xf32>
    %48 = tpu.matmul %46, %47, %cst_46 {dimension_numbers = #tpu.dot_dimension_numbers<[1], [0], [0], [1], [0, 0, 1, 1], [], []>} : vector<256x32xbf16>, vector<32x128xbf16>, vector<256x128xf32> -> vector<256x128xf32>
    %49 = arith.addf %43, %48 : vector<256x128xf32>
    %c0_47 = arith.constant 0 : index
    %c2_48 = arith.constant 2 : index
    %c2_49 = arith.constant 2 : index
    %c0_50 = arith.constant 0 : index
    %50 = vector.load %arg1[%c0_47, %c2_48, %c2_49, %c0_50] : memref<1x18x18x32xbf16, #tpu.memory_space<vmem>>, vector<1x16x16x32xbf16>
    %51 = vector.shape_cast %50 : vector<1x16x16x32xbf16> to vector<16x16x32xbf16>
    %52 = vector.shape_cast %51 : vector<16x16x32xbf16> to vector<256x32xbf16>
    %c256 = arith.constant 256 : index
    %c0_51 = arith.constant 0 : index
    %53 = vector.load %arg2[%c256, %c0_51] : memref<288x128xbf16, #tpu.memory_space<vmem>>, vector<32x128xbf16>
    %cst_52 = arith.constant dense<0.000000e+00> : vector<256x128xf32>
    %54 = tpu.matmul %52, %53, %cst_52 {dimension_numbers = #tpu.dot_dimension_numbers<[1], [0], [0], [1], [0, 0, 1, 1], [], []>} : vector<256x32xbf16>, vector<32x128xbf16>, vector<256x128xf32> -> vector<256x128xf32>
    %55 = arith.addf %49, %54 : vector<256x128xf32>
    %56 = vector.shape_cast %55 : vector<256x128xf32> to vector<16x16x128xf32>
    %57 = arith.truncf %56 : vector<16x16x128xf32> to vector<16x16x128xbf16>
    %c0_53 = arith.constant 0 : index
    %c0_54 = arith.constant 0 : index
    %c0_55 = arith.constant 0 : index
    %c0_56 = arith.constant 0 : index
    %58 = vector.load %arg4[%c0_53, %c0_54, %c0_55, %c0_56] : memref<1x16x16x128xbf16, #tpu.memory_space<vmem>>, vector<1x16x16x128xbf16>
    %59 = vector.shape_cast %58 : vector<1x16x16x128xbf16> to vector<16x16x128xbf16>
    %60 = vector.shape_cast %57 : vector<16x16x128xbf16> to vector<1x16x16x128xbf16>
    tpu.vector_store %arg4[%c0_53, %c0_54, %c0_55, %c0_56], %60 {strides = array<i32>} : memref<1x16x16x128xbf16, #tpu.memory_space<vmem>>, vector<1x16x16x128xbf16>,
    return
  }
  func.func @transform_0(%arg0: i32) -> (i32, i32, i32, i32) {
    %c0_i32 = arith.constant 0 : i32
    %c0_i32_0 = arith.constant 0 : i32
    %c0_i32_1 = arith.constant 0 : i32
    %c0_i32_2 = arith.constant 0 : i32
    return %arg0, %c0_i32, %c0_i32_0, %c0_i32_1 : i32, i32, i32, i32
  }
  func.func @transform_1(%arg0: i32) -> (i32, i32) {
    %c0_i32 = arith.constant 0 : i32
    %c0_i32_0 = arith.constant 0 : i32
    %c0_i32_1 = arith.constant 0 : i32
    return %c0_i32, %c0_i32_0 : i32, i32
  }
  func.func @transform_2(%arg0: i32) -> (i32, i32) {
    %c0_i32 = arith.constant 0 : i32
    %c0_i32_0 = arith.constant 0 : i32
    %c0_i32_1 = arith.constant 0 : i32
    return %c0_i32, %c0_i32_0 : i32, i32
  }
  func.func @transform_3(%arg0: i32) -> (i32, i32, i32, i32) {
    %c0_i32 = arith.constant 0 : i32
    %c0_i32_0 = arith.constant 0 : i32
    %c0_i32_1 = arith.constant 0 : i32
    %c0_i32_2 = arith.constant 0 : i32
    return %arg0, %c0_i32, %c0_i32_0, %c0_i32_1 : i32, i32, i32, i32
  }
}

</mosaic_0001>

<bundles_post_ra>
// kernel: tile.6
= control target key start
LH: loop header
LB: loop body
LE: loop exit
PB: predicated region body
PF: predicated region fallthrough
CT: control target
= control target key end

     0   :  { %s22_s0 = inlined_call_operand.vmem [shape: f32[32], index: 0, kind: input, shape index: {}]   ;;  %s23_s1 = inlined_call_operand.vmem [shape: f32[4,32], index: 1, kind: output, shape index: {}]  }
   0x1   :  { %v4_v0 = vld [vmem:[%s22_s0] ss:$0 sm:$0xff] }
   0x2   :  { %5 = vst [vmem:[%s23_s1] sm:$0xf] %v4_v0 }

// kernel: tile.7
= control target key start
LH: loop header
LB: loop body
LE: loop exit
PB: predicated region body
PF: predicated region fallthrough
CT: control target
= control target key end

     0   :  { %vm7_vm0 = vcmask 261120   ;;  %s37_s8 = smov 32   ;;  %s38_s9 = smov 64   ;;  %vm13_vm1 = vcmask 1048320   ;;  %vm19_vm2 = vcmask 785920   ;;  %vm25_vm3 = vcmask 523520   ;;  %s55_s0 = inlined_call_operand.vmem [shape: f32[4,32], index: 0, kind: input, shape index: {}]   ;;  %s56_s1 = inlined_call_operand.vmem [shape: f32[1,128], index: 1, kind: output, shape index: {}]  }
   0x1   :  { %v4_v0 = vld [vmem:[%s55_s0] sm:$0xf]  ;;  %s36_s0 = smov 96  }
   0x2   :  { %5 = vst [vmem:[#allocation1] sm:$0xf] %v4_v0 }
   0x9   :  { %v10_v1 = vld [vmem:[#allocation1 + $0x3] sm:$0x1]   ;;  %v22_v2 = vld [vmem:[#allocation1 + $0x1] sm:$0x1]   ;;  %v6_v3 = vld [vmem:[#allocation1] sm:$0x1]  }
   0xa   :  { %11 = vrot.lane.b32.xlu0 %v10_v1, %s36_s0  ;;  %23 = vrot.lane.b32.xlu1 %v22_v2, %s37_s8  ;;  %v16_v4 = vld [vmem:[#allocation1 + $0x2] sm:$0x1]   ;;  %8 = vst.msk [vmem:[#allocation0] sm:$0x1] %vm7_vm0, %v6_v3  }
   0xe   :  { %17 = vrot.lane.b32.xlu0 %v16_v4, %s38_s9 }
  0x7c   :  { %v12_v5 = vpop.permute.xlu0 %11   ;;  %v24_v6 = vpop.permute.xlu1 %23  }
  0x7d   :  { %14 = vst.msk [vmem:[#allocation0] sm:$0x1] %vm13_vm1, %v12_v5  }
  0x80   :  { %v18_v7 = vpop.permute.xlu0 %17  }
  0x81   :  { %20 = vst.msk [vmem:[#allocation0] sm:$0x1] %vm19_vm2, %v18_v7  }
  0x82   :  { %26 = vst.msk [vmem:[#allocation0] sm:$0x1] %vm25_vm3, %v24_v6  }
  0x89   :  { %v30_v8 = vld [vmem:[#allocation0] sm:$0x1] }
  0x8a   :  { %32 = vst [vmem:[%s56_s1] sm:$0x1] %v30_v8 }

// kernel: _lambda_.1
= control target key start
LH: loop header
LB: loop body
LE: loop exit
PB: predicated region body
PF: predicated region fallthrough
CT: control target
= control target key end

     0   :  { %s6750_s12 = smov 0   ;;  %s8406_s0 = inlined_call_operand.vmem [shape: bf16[2,18,18,32], index: 0, kind: input, shape index: {}]   ;;  %s8407_s1 = inlined_call_operand.vmem [shape: bf16[288,128], index: 1, kind: input, shape index: {}]   ;;  %s8408_s2 = inlined_call_operand.vmem [shape: f32[1,128], index: 2, kind: input, shape index: {}]   ;;  %s8409_s3 = inlined_call_operand.vmem [shape: bf16[2,16,16,128], index: 3, kind: output, shape index: {}]  }
   0x1 LB: > { %s5132_s13 = sadd.s32 4294967295, %s6728_s12   ;;  %p5136_p0 = scmp.ge.s32.totalorder %s6728_s12, 1  ;;  %s6728_s12 = sphi %s6750_s12, %s13_s12  }
   0x2   : > { %p137_p1 = scmp.lt.s32.totalorder %s6728_s12, 3 }
   0x4   : > { %p138_p2 = pnand %p5136_p0, %p137_p1 }
   0x5   : > { %v6636_v0 = vld [vmem:[%s8407_s1] sm:$0xff] (!%p138_p2)   ;;  %p161_p3 = scmp.lt.s32.totalorder (!%p138_p2), %s5132_s13, 1  ;;  %v6637_v1 = vld [vmem:[%s8407_s1 + $0x8] sm:$0xff] (!%p138_p2)   ;;  %v6642_v4 = vld [vmem:[%s8407_s1 + $0x10] sm:$0xff] (!%p138_p2)   ;;  %vm307_vm0 = vcmask (!%p138_p2), 261120   ;;  %vm1321_vm4 = vcmask (!%p138_p2), 1042432  }
   0x6   : > { %141 = sbr.rel (%p138_p2) target bundleno = 541 (0x21d), region = 32  ;;  %6011 = vmatprep.subr.bf16.mxu1 (!%p138_p2), %v6636_v0  ;;  %v6640_v2 = vld [vmem:[%s8407_s1 + $0x40] sm:$0xff] (!%p138_p2)   ;;  %v6641_v3 = vld [vmem:[%s8407_s1 + $0x48] sm:$0xff] (!%p138_p2)   ;;  %vm565_vm1 = vsmask.f32 (!%p138_p2), 3328  ;;  %v6784_v5 = vld [vmem:[%s8407_s1 + $0x50] sm:$0xff] (!%p138_p2)  }
   0x7   : > { %6012 = vmatpush3.bf16.msra.mxu1 (!%p138_p2), %v6636_v0  ;;  %6155 = vmatprep.subr.bf16.mxu0 (!%p138_p2), %v6640_v2  ;;  %vm566_vm2 = vsmask.f32 (!%p138_p2), 7440  ;;  %vm1322_vm5 = vcmask (!%p138_p2), 1046532  }
   0x8   : > { %6013 = vmatprep.subr.bf16.mxu1 (!%p138_p2), %v6637_v1  ;;  %6156 = vmatpush3.bf16.msra.mxu0 (!%p138_p2), %v6640_v2  ;;  %vm6818_vm3 = vmor (!%p138_p2), %vm565_vm1, %vm566_vm2 }
   0x9   : > { %6157 = vmatprep.subr.bf16.mxu0 (!%p138_p2), %v6641_v3  ;;  %vm6953_vm6 = vmor (!%p138_p2), %vm1321_vm4, %vm1322_vm5 }
   0xb   : > { %6014 = vmatpush3.bf16.msra.mxu1 (!%p138_p2), %v6637_v1 }
   0xc   : > { %6047 = vmatprep.subr.bf16.mxu1 (!%p138_p2), %v6642_v4  ;;  %6158 = vmatpush3.bf16.msra.mxu0 (!%p138_p2), %v6641_v3 }
   0xd   : > { %s8418_s13 = smov (!%p161_p3, %s5132_s13), 1  ;;  %6191 = vmatprep.subr.bf16.mxu0 %v6784_v5 }
   0xe   : > { %s6627_s22 = smul.u32 216, %s8418_s13  ;;  %s5721_s8 = sshll.u32 %s8418_s13, 7 }
   0xf   : > { %s8357_s11 = scalar_lea.vmem %s8409_s3, %s5721_s8 }
  0x10   : > { %s6779_s27 = scalar_lea.vmem %s8406_s0, %s6627_s22 }
  0x11   : > { %v6638_v6 = vld [vmem:[%s6779_s27] sm:$0xff]   ;;  %v6639_v7 = vld [vmem:[%s6779_s27 + $0xc] sm:$0xff]   ;;  %v6643_v8 = vld [vmem:[%s6779_s27 + $0x18] sm:$0xff]  }
  0x12   : > { %6015 = vmatprep.mubr.msk.bf16.mxu1 %vm307_vm0, %v6638_v6  ;;  %v5325_v9 = vld [vmem:[%s6779_s27 + $0xc] sm:$0xf]  ;;  %v6795_v10 = vld [vmem:[%s6779_s27 + $0x10] sm:$0xf]  ;;  %v6798_v11 = vld [vmem:[%s6779_s27 + $0x14] sm:$0x1] }
  0x13   : > { %6016 = vmatmul.mubr.msk.bf16.vlgmr.msra.gmra.mrb[0].mxu1 %vm307_vm0, %v6639_v7  ;;  %v2160_v12 = vshrl.u32 %v5325_v9, 16  ;;  %v2163_v13 = vshll.u32 %v5325_v9, 16  ;;  %v2169_v14 = vshll.u32 %v6795_v10, 16  ;;  %v2173_v15 = vshrl.u32 %v6795_v10, 16  ;;  %v5328_v16 = vld [vmem:[%s6779_s27 + $0x18] sm:$0xf] }
  0x14   : > { %6019 = vmatprep.mubr.msk.bf16.mxu1 %vm307_vm0, %v6643_v8  ;;  %6048 = vmatpush3.bf16.msra.mxu1 %v6642_v4  ;;  %v6644_v17 = vld [vmem:[%s6779_s27 + $0x24] sm:$0xff]   ;;  %v2179_v18 = vshll.u32 %v6798_v11, 16  ;;  %v2914_v19 = vrot.slane %v6795_v10, 5  ;;  %v6807_v20 = vld [vmem:[%s6779_s27 + $0x1c] sm:$0xf]  ;;  %v2184_v21 = vshrl.u32 %v5328_v16, 16 }
  0x15   : > { %v2162_v22 = vrot.slane %v2160_v12, 4  ;;  %v2165_v23 = vrot.slane %v2163_v13, 5  ;;  %v2171_v24 = vrot.slane %v2169_v14, 5  ;;  %v2175_v25 = vrot.slane %v2173_v15, 4  ;;  %v6810_v26 = vld [vmem:[%s6779_s27 + $0x20] sm:$0x1] }
  0x16   : > { %v2181_v27 = vrot.slane %v2179_v18, 5  ;;  %v2186_v28 = vrot.slane %v2184_v21, 4  ;;  %v2187_v29 = vshll.u32 %v5328_v16, 16  ;;  %v2193_v30 = vshll.u32 %v6807_v20, 16  ;;  %v6646_v35 = vld [vmem:[%s6779_s27 + $0x30] sm:$0xff]   ;;  %v6647_v58 = vld [vmem:[%s6779_s27 + $0x3c] sm:$0xff]  }
  0x17   : > { %v2166_v31 = vor.u32 %v2165_v23, %v2162_v22  ;;  %v2176_v32 = vor.u32 %v2175_v25, %v2171_v24  ;;  %v2197_v33 = vshrl.u32 %v6807_v20, 16  ;;  %v2203_v34 = vshll.u32 %v6810_v26, 16  ;;  %v5331_v48 = vld [vmem:[%s6779_s27 + $0x24] sm:$0xf]  ;;  %v6833_v49 = vld [vmem:[%s6779_s27 + $0x28] sm:$0xf] }
  0x18   : > { %v2917_v37 = vrot.slane %v6798_v11, 5  ;;  %v2189_v38 = vrot.slane %v2187_v29, 5  ;;  %v2195_v39 = vrot.slane %v2193_v30, 5  ;;  %v2921_v40 = vrot.slane %v6807_v20, 5  ;;  %v6840_v53 = vld [vmem:[%s6779_s27 + $0x2c] sm:$0x1] }
  0x19   : > { %v2167_v41 = vrot.slane %v2166_v31, 4  ;;  %v2177_v42 = vrot.slane %v2176_v32, 4  ;;  %v2199_v43 = vrot.slane %v2197_v33, 4  ;;  %v2924_v44 = vrot.slane %v6810_v26, 5  ;;  %v5334_v55 = vld [vmem:[%s6779_s27 + $0x30] sm:$0xf] }
  0x1a   : > { %v2190_v45 = vor.u32 %v2189_v38, %v2186_v28  ;;  %v2205_v46 = vrot.slane %v2203_v34, 5  ;;  %v6828_v47 = vrot.slane %v2921_v40, 4  ;;  %v2208_v54 = vshrl.u32 %v5331_v48, 16  ;;  %v6846_v61 = vld [vmem:[%s6779_s27 + $0x34] sm:$0xf]  ;;  %v6648_v8 = vld [vmem:[%s6779_s27 + $0x48] sm:$0xff]  }
  0x1b   : > { %6020 = vmatmul.mubr.msk.bf16.gmra.mrb[4].mxu1 %vm307_vm0, %v6644_v17  ;;  %v2172_v50 = vsel %vm6818_vm3, %v2167_v41, %v2171_v24  ;;  %v2182_v51 = vsel %vm6818_vm3, %v2177_v42, %v2181_v27  ;;  %v2200_v52 = vor.u32 %v2199_v43, %v2195_v39  ;;  %v2211_v59 = vshll.u32 %v5331_v48, 16  ;;  %v6851_v2 = vld [vmem:[%s6779_s27 + $0x38] sm:$0x1]  ;;  %v5337_v27 = vld [vmem:[%s6779_s27 + $0x3c] sm:$0xf] }
  0x1c   : > { %6023 = vmatprep.mubr.msk.bf16.mxu1 %vm307_vm0, %v6646_v35  ;;  %v5373_v56 = vcombine.low %v2172_v50, %v2182_v51  ;;  %v2191_v57 = vrot.slane %v2190_v45, 4  ;;  %v2217_v60 = vshll.u32 %v6833_v49, 16  ;;  %v2210_v63 = vrot.slane %v2208_v54, 4  ;;  %v6650_v15 = vld [vmem:[%s8407_s1 + $0x58] sm:$0xff]   ;;  %v6873_v31 = vld [vmem:[%s6779_s27 + $0x40] sm:$0xf] }
  0x1d   : > { %v2201_v62 = vrot.slane %v2200_v52, 4  ;;  %v2221_v0 = vshrl.u32 %v6833_v49, 16  ;;  %v2227_v1 = vshll.u32 %v6840_v53, 16  ;;  %v2213_v4 = vrot.slane %v2211_v59, 5  ;;  %v6653_v28 = vld [vmem:[%s8407_s1 + $0x18] sm:$0xff]  }
  0x1e   : > { %6159 = vmatprep.mubr.msk.bf16.mxu0 %vm307_vm0, %v5373_v56  ;;  %v2196_v3 = vsel %vm6818_vm3, %v2191_v57, %v2195_v39  ;;  %v2219_v6 = vrot.slane %v2217_v60, 5  ;;  %v2232_v7 = vshrl.u32 %v5334_v55, 16  ;;  %v2235_v14 = vshll.u32 %v5334_v55, 16  ;;  %v6876_v32 = vld [vmem:[%s6779_s27 + $0x44] sm:$0x1]  ;;  %v6649_v39 = vld [vmem:[%s6779_s27 + $0x54] sm:$0xff]   ;;  %6049 = vmatprep.subr.bf16.mxu1 %v6653_v28 }
  0x1f   : > { %v2206_v9 = vsel %vm6818_vm3, %v2201_v62, %v2205_v46  ;;  %v2223_v12 = vrot.slane %v2221_v0, 4  ;;  %v2229_v13 = vrot.slane %v2227_v1, 5  ;;  %v2214_v17 = vor.u32 %v2213_v4, %v2210_v63  ;;  %v6651_v46 = vld [vmem:[%s6779_s27 + $0x60] sm:$0xff]   ;;  %6050 = vmatpush3.bf16.msra.mxu1 %v6653_v28  ;;  %v5340_v52 = vld [vmem:[%s6779_s27 + $0x48] sm:$0xf] }
  0x20   : > { %v5374_v16 = vcombine.low %v2196_v3, %v2206_v9  ;;  %v2234_v18 = vrot.slane %v2232_v7, 4  ;;  %v2241_v21 = vshll.u32 %v6846_v61, 16  ;;  %v2237_v23 = vrot.slane %v2235_v14, 5  ;;  %v6889_v54 = vld [vmem:[%s6779_s27 + $0x4c] sm:$0xf]  ;;  %v6897_v60 = vld [vmem:[%s8407_s1 + $0x60] sm:$0xff]  }
  0x21   : > { %v2224_v22 = vor.u32 %v2223_v12, %v2219_v6  ;;  %v2245_v24 = vshrl.u32 %v6846_v61, 16  ;;  %v2251_v25 = vshll.u32 %v6851_v2, 16  ;;  %v2215_v29 = vrot.slane %v2214_v17, 4  ;;  %v6892_v59 = vld [vmem:[%s6779_s27 + $0x50] sm:$0x1] }
  0x22   : > { %6160 = vmatmul.mubr.msk.bf16.vlgmr.msra.gmra.mrb[0].mxu0 %vm307_vm0, %v5374_v16  ;;  %v2243_v30 = vrot.slane %v2241_v21, 5  ;;  %v2238_v34 = vor.u32 %v2237_v23, %v2234_v18  ;;  %v2256_v42 = vshrl.u32 %v5337_v27, 16  ;;  %v2259_v43 = vshll.u32 %v5337_v27, 16  ;;  %v5343_v18 = vld [vmem:[%s6779_s27 + $0x54] sm:$0xf] }
  0x23   : > { %6024 = vmatmul.mubr.msk.bf16.gmra.mrb[8].mxu1 %vm307_vm0, %v6647_v58  ;;  %6192 = vmatpush3.bf16.msra.mxu0 %v6784_v5  ;;  %v2225_v33 = vrot.slane %v2224_v22, 4  ;;  %v2247_v35 = vrot.slane %v2245_v24, 4  ;;  %v2253_v38 = vrot.slane %v2251_v25, 5  ;;  %v2220_v41 = vsel %vm6818_vm3, %v2215_v29, %v2219_v6  ;;  %v6913_v25 = vld [vmem:[%s6779_s27 + $0x58] sm:$0xf]  ;;  %v6652_v29 = vld [vmem:[%s6779_s27 + $0x6c] sm:$0xff]  }
  0x24   : > { %6027 = vmatprep.mubr.msk.bf16.mxu1 %vm307_vm0, %v6648_v8  ;;  %v2265_v45 = vshll.u32 %v6873_v31, 16  ;;  %6193 = vmatprep.subr.bf16.mxu0 %v6650_v15  ;;  %v2239_v48 = vrot.slane %v2238_v34, 4  ;;  %v2269_v51 = vshrl.u32 %v6873_v31, 16  ;;  %v2258_v56 = vrot.slane %v2256_v42, 4  ;;  %v5346_v42 = vld [vmem:[%s6779_s27 + $0x60] sm:$0xf] }
  0x25   : > { %v2230_v5 = vsel %vm6818_vm3, %v2225_v33, %v2229_v13  ;;  %v2248_v50 = vor.u32 %v2247_v35, %v2243_v30  ;;  %v2261_v57 = vrot.slane %v2259_v43, 5  ;;  %v2275_v1 = vshll.u32 %v6876_v32, 16  ;;  %v6927_v43 = vld [vmem:[%s6779_s27 + $0x64] sm:$0xf]  ;;  %v5410_v11 = vld [vmem:[%s6779_s27 + $0x30] sm:$0xe] }
  0x26   : > { %v5375_v55 = vcombine.low %v2220_v41, %v2230_v5  ;;  %v2267_v58 = vrot.slane %v2265_v45, 5  ;;  %v2244_v62 = vsel %vm6818_vm3, %v2239_v48, %v2243_v30  ;;  %v2271_v0 = vrot.slane %v2269_v51, 4  ;;  %v6920_v30 = vld [vmem:[%s6779_s27 + $0x5c] sm:$0x1] }
  0x27   : > { %v2249_v63 = vrot.slane %v2248_v50, 4  ;;  %6194 = vmatpush3.bf16.msra.mxu0 %v6650_v15  ;;  %v2262_v3 = vor.u32 %v2261_v57, %v2258_v56  ;;  %v2280_v4 = vshrl.u32 %v5340_v52, 16  ;;  %v2283_v6 = vshll.u32 %v5340_v52, 16  ;;  %v6930_v50 = vld [vmem:[%s6779_s27 + $0x68] sm:$0x1]  ;;  %v6654_v51 = vld [vmem:[%s6779_s27 + $0x78] sm:$0xff]  }
  0x28   : > { %6163 = vmatprep.mubr.msk.bf16.mxu0 %vm307_vm0, %v5375_v55  ;;  %v2289_v7 = vshll.u32 %v6889_v54, 16  ;;  %6227 = vmatprep.subr.bf16.mxu0 %v6897_v60  ;;  %v2272_v9 = vor.u32 %v2271_v0, %v2267_v58  ;;  %v2277_v12 = vrot.slane %v2275_v1, 5  ;;  %v2293_v13 = vshrl.u32 %v6889_v54, 16 }
  0x29   : > { %v2254_v8 = vsel %vm6818_vm3, %v2249_v63, %v2253_v38  ;;  %v2263_v15 = vrot.slane %v2262_v3, 4  ;;  %v2282_v16 = vrot.slane %v2280_v4, 4  ;;  %v2285_v17 = vrot.slane %v2283_v6, 5 }
  0x2a   : > { %v5376_v14 = vcombine.low %v2244_v62, %v2254_v8  ;;  %v2273_v21 = vrot.slane %v2272_v9, 4  ;;  %v2291_v22 = vrot.slane %v2289_v7, 5  ;;  %v2295_v23 = vrot.slane %v2293_v13, 4  ;;  %v6945_v7 = vld [vmem:[%s8407_s1 + $0x20] sm:$0xff]  }
  0x2b   : > { %6028 = vmatmul.mubr.msk.bf16.gmra.mrb[12].mxu1 %vm307_vm0, %v6649_v39  ;;  %v2299_v24 = vshll.u32 %v6892_v59, 16  ;;  %v2268_v27 = vsel %vm6818_vm3, %v2263_v15, %v2267_v58  ;;  %v2286_v28 = vor.u32 %v2285_v17, %v2282_v16  ;;  %v2304_v33 = vshrl.u32 %v5343_v18, 16  ;;  %6083 = vmatprep.subr.bf16.mxu1 %v6945_v7 }
  0x2c   : > { %6031 = vmatprep.mubr.msk.bf16.mxu1 %vm307_vm0, %v6651_v46  ;;  %6164 = vmatmul.mubr.msk.bf16.gmra.mrb[4].mxu0 %vm307_vm0, %v5376_v14  ;;  %v2307_v34 = vshll.u32 %v5343_v18, 16  ;;  %v2278_v35 = vsel %vm6818_vm3, %v2273_v21, %v2277_v12  ;;  %v2296_v38 = vor.u32 %v2295_v23, %v2291_v22  ;;  %v2313_v41 = vshll.u32 %v6913_v25, 16  ;;  %v6655_v18 = vld [vmem:[%s6779_s27 + $0x84] sm:$0xff]  }
  0x2d   : > { %v2301_v39 = vrot.slane %v2299_v24, 5  ;;  %v5377_v45 = vcombine.low %v2268_v27, %v2278_v35  ;;  %v2287_v46 = vrot.slane %v2286_v28, 4  ;;  %v2306_v5 = vrot.slane %v2304_v33, 4 }
  0x2e   : > { %v2309_v48 = vrot.slane %v2307_v34, 5  ;;  %v2297_v52 = vrot.slane %v2296_v38, 4  ;;  %v2315_v55 = vrot.slane %v2313_v41, 5  ;;  %v2317_v56 = vshrl.u32 %v6913_v25, 16  ;;  %v5408_v38 = vld [vmem:[%s6779_s27 + $0x18] sm:$0xe] }
  0x2f   : > { %v2323_v57 = vshll.u32 %v6920_v30, 16  ;;  %6167 = vmatprep.mubr.msk.bf16.mxu0 %vm307_vm0, %v5377_v45  ;;  %v2292_v58 = vsel %vm6818_vm3, %v2287_v46, %v2291_v22  ;;  %v2328_v63 = vshrl.u32 %v5346_v42, 16  ;;  %v2331_v0 = vshll.u32 %v5346_v42, 16  ;;  %v5407_v22 = vld [vmem:[%s6779_s27 + $0xc] sm:$0xe] }
  0x30   : > { %v2310_v62 = vor.u32 %v2309_v48, %v2306_v5  ;;  %v2302_v1 = vsel %vm6818_vm3, %v2297_v52, %v2301_v39  ;;  %v2319_v3 = vrot.slane %v2317_v56, 4  ;;  %v2337_v6 = vshll.u32 %v6927_v43, 16 }
  0x31   : > { %v2325_v4 = vrot.slane %v2323_v57, 5  ;;  %v5378_v8 = vcombine.low %v2292_v58, %v2302_v1  ;;  %v2330_v12 = vrot.slane %v2328_v63, 4  ;;  %v2333_v13 = vrot.slane %v2331_v0, 5 }
  0x32   : > { %v2311_v9 = vrot.slane %v2310_v62, 4  ;;  %v2320_v14 = vor.u32 %v2319_v3, %v2315_v55  ;;  %v2339_v15 = vrot.slane %v2337_v6, 5  ;;  %v2341_v16 = vshrl.u32 %v6927_v43, 16  ;;  %v5411_v62 = vld [vmem:[%s6779_s27 + $0x3c] sm:$0xe] }
  0x33   : > { %6032 = vmatmul.mubr.msk.bf16.gmra.mrb[16].mxu1 %vm307_vm0, %v6652_v29  ;;  %v2347_v17 = vshll.u32 %v6930_v50, 16  ;;  %v2334_v24 = vor.u32 %v2333_v13, %v2330_v12  ;;  %v5423_v27 = vrot.slane %v5407_v22, 9  ;;  %v2916_v28 = vrot.slane %v2914_v19, 4  ;;  %v6657_v29 = vld [vmem:[%s6779_s27 + $0x90] sm:$0xff]   ;;  %v5412_v3 = vld [vmem:[%s6779_s27 + $0x48] sm:$0xe] }
  0x34   : > { %6035 = vmatprep.mubr.msk.bf16.mxu1 %vm307_vm0, %v6654_v51  ;;  %6168 = vmatmul.mubr.msk.bf16.gmra.mrb[8].mxu0 %vm307_vm0, %v5378_v8  ;;  %v2316_v23 = vsel %vm6818_vm3, %v2311_v9, %v2315_v55  ;;  %v2321_v33 = vrot.slane %v2320_v14, 4  ;;  %v2343_v34 = vrot.slane %v2341_v16, 4  ;;  %v2928_v39 = vrot.slane %v6833_v49, 5  ;;  %v5409_v51 = vld [vmem:[%s6779_s27 + $0x24] sm:$0xe]  ;;  %v6658_v6 = vld [vmem:[%s6779_s27 + $0x9c] sm:$0xff]  }
  0x35   : > { %v2349_v35 = vrot.slane %v2347_v17, 5  ;;  %v2335_v41 = vrot.slane %v2334_v24, 4  ;;  %v2915_v42 = vsel %vm6953_vm6, %v5423_v27, %v2914_v19  ;;  %v2918_v45 = vsel %vm6953_vm6, %v2916_v28, %v2917_v37  ;;  %v6659_v8 = vld [vmem:[%s6779_s27 + $0xa8] sm:$0xff]   ;;  %v521_v28 = vld [vmem:[%s6779_s27 + $0x10] sm:$0xf] }
  0x36   : > { %v5424_v46 = vrot.slane %v5408_v38, 9  ;;  %v2326_v5 = vsel %vm6818_vm3, %v2321_v33, %v2325_v4  ;;  %v2344_v48 = vor.u32 %v2343_v34, %v2339_v15  ;;  %v5439_v55 = vcombine.low %v2915_v42, %v2918_v45  ;;  %v517_v4 = vld [vmem:[%s6779_s27] sm:$0xf]  ;;  %v519_v16 = vld [vmem:[%s6779_s27 + $0x8] sm:$0x1] }
  0x37   : > { %v5379_v52 = vcombine.low %v2316_v23, %v2326_v5  ;;  %v6983_v10 = vsel %vm6953_vm6, %v6828_v47, %v2924_v44  ;;  %v5425_v19 = vrot.slane %v5409_v51, 9  ;;  %v2340_v37 = vsel %vm6818_vm3, %v2335_v41, %v2339_v15  ;;  %v520_v27 = vld [vmem:[%s6779_s27 + $0xc] sm:$0xf]  ;;  %v522_v42 = vld [vmem:[%s6779_s27 + $0x14] sm:$0x1] }
  0x38   : > { %v2345_v49 = vrot.slane %v2344_v48, 4  ;;  %v2930_v56 = vrot.slane %v2928_v39, 4  ;;  %v2931_v57 = vrot.slane %v6840_v53, 5  ;;  %v6995_v26 = vsel %vm6953_vm6, %v5424_v46, %v2921_v40 }
  0x39   : > { %6171 = vmatprep.mubr.msk.bf16.mxu0 %vm307_vm0, %v5379_v52  ;;  %v5426_v44 = vrot.slane %v5410_v11, 9  ;;  %v2935_v47 = vrot.slane %v6846_v61, 5  ;;  %v2938_v58 = vrot.slane %v6851_v2, 5  ;;  %v7004_v20 = vsel %vm6953_vm6, %v5425_v19, %v2928_v39  ;;  %v5413_v19 = vld [vmem:[%s6779_s27 + $0x54] sm:$0xe]  ;;  %v6662_v11 = vld [vmem:[%s8407_s1 + $0x68] sm:$0xff]  }
  0x3a   : > { %v2350_v53 = vsel %vm6818_vm3, %v2345_v49, %v2349_v35  ;;  %v7008_v40 = vsel %vm6953_vm6, %v2930_v56, %v2931_v57  ;;  %v2942_v63 = vrot.slane %v6873_v31, 5  ;;  %v2945_v1 = vrot.slane %v6876_v32, 5  ;;  %v518_v32 = vld [vmem:[%s6779_s27 + $0x4] sm:$0xf] }
  0x3b   : > { %6036 = vmatmul.mubr.msk.bf16.gmra.mrb[20].mxu1 %vm307_vm0, %v6655_v18  ;;  %v5380_v0 = vcombine.low %v2340_v37, %v2350_v53  ;;  %v7014_v61 = vsel %vm6953_vm6, %v5426_v44, %v2935_v47  ;;  %v2937_v2 = vrot.slane %v2935_v47, 4  ;;  %v5427_v9 = vrot.slane %v5411_v62, 9  ;;  %v6660_v44 = vld [vmem:[%s6779_s27 + $0xb4] sm:$0xff]  }
  0x3c   : > { %6039 = vmatprep.mubr.msk.bf16.mxu1 %vm307_vm0, %v6657_v29  ;;  %v2944_v12 = vrot.slane %v2942_v63, 4  ;;  %v5428_v13 = vrot.slane %v5412_v3, 9  ;;  %v2949_v31 = vrot.slane %v6889_v54, 5  ;;  %v5440_v14 = vcombine.low %v6995_v26, %v6983_v10  ;;  %v5414_v26 = vld [vmem:[%s6779_s27 + $0x60] sm:$0xe] }
  0x3d   : > { %6172 = vmatmul.mubr.msk.bf16.gmra.mrb[12].mxu0 %vm307_vm0, %v5380_v0  ;;  %v7027_v15 = vsel %vm6953_vm6, %v2937_v2, %v2938_v58  ;;  %v569_v17 = vshrl.u32 %v517_v4, 16  ;;  %v572_v18 = vshll.u32 %v517_v4, 16  ;;  %v5441_v22 = vcombine.low %v7004_v20, %v7008_v40  ;;  %v523_v2 = vld [vmem:[%s6779_s27 + $0x18] sm:$0xf] }
  0x3e   : > { %6195 = vmatprep.mubr.msk.bf16.mxu0 %vm307_vm0, %v5439_v55  ;;  %v5442_v54 = vcombine.low %v7014_v61, %v7027_v15  ;;  %v7038_v23 = vsel %vm6953_vm6, %v5427_v9, %v2942_v63  ;;  %v2952_v24 = vrot.slane %v6892_v59, 5  ;;  %v7045_v29 = vsel %vm6953_vm6, %v2944_v12, %v2945_v1  ;;  %v6663_v61 = vld [vmem:[%s8407_s1 + $0x28] sm:$0xff]  }
  0x3f   : > { %v2951_v33 = vrot.slane %v2949_v31, 4  ;;  %v571_v34 = vrot.slane %v569_v17, 4  ;;  %v574_v35 = vrot.slane %v572_v18, 5  ;;  %v578_v38 = vshll.u32 %v518_v32, 16  ;;  %v526_v17 = vld [vmem:[%s6779_s27 + $0x24] sm:$0xf] }
  0x40   : > { %v582_v39 = vshrl.u32 %v518_v32, 16  ;;  %v588_v41 = vshll.u32 %v519_v16, 16  ;;  %v593_v45 = vshrl.u32 %v520_v27, 16  ;;  %v7052_v59 = vsel %vm6953_vm6, %v5428_v13, %v2949_v31  ;;  %v7089_v32 = vld [vmem:[%s6779_s27 + $0x20] sm:$0x1] }
  0x41   : > { %v575_v46 = vor.u32 %v574_v35, %v571_v34  ;;  %v596_v5 = vshll.u32 %v520_v27, 16  ;;  %v602_v48 = vshll.u32 %v521_v28, 16  ;;  %v5443_v51 = vcombine.low %v7038_v23, %v7045_v29 }
  0x42   : > { %v7058_v52 = vsel %vm6953_vm6, %v2951_v33, %v2952_v24  ;;  %v580_v55 = vrot.slane %v578_v38, 5  ;;  %v584_v10 = vrot.slane %v582_v39, 4  ;;  %v590_v49 = vrot.slane %v588_v41, 5  ;;  %v7112_v41 = vld [vmem:[%s6779_s27 + $0x28] sm:$0xf] }
  0x43   : > { %6040 = vmatmul.mubr.msk.bf16.gmra.mrb[24].mxu1 %vm307_vm0, %v6658_v6  ;;  %v576_v37 = vrot.slane %v575_v46, 4  ;;  %v595_v56 = vrot.slane %v593_v45, 4  ;;  %v598_v57 = vrot.slane %v596_v5, 5  ;;  %v604_v58 = vrot.slane %v602_v48, 5  ;;  %v7120_v46 = vld [vmem:[%s6779_s27 + $0x2c] sm:$0x1] }
  0x44   : > { %6043 = vmatprep.mubr.msk.bf16.mxu1 %vm307_vm0, %v6659_v8  ;;  %v585_v47 = vor.u32 %v584_v10, %v580_v55  ;;  %v606_v53 = vshrl.u32 %v521_v28, 16  ;;  %v612_v20 = vshll.u32 %v522_v42, 16  ;;  %v5429_v62 = vrot.slane %v5413_v19, 9 }
  0x45   : > { %6196 = vmatmul.mubr.msk.bf16.vlgmr.msra.gmra.mrb[0].mxu0 %vm307_vm0, %v5440_v14  ;;  %v599_v40 = vor.u32 %v598_v57, %v595_v56  ;;  %v2956_v63 = vrot.slane %v6913_v25, 5  ;;  %v2959_v0 = vrot.slane %v6920_v30, 5  ;;  %v581_v1 = vsel %vm6818_vm3, %v576_v37, %v580_v55  ;;  %v7077_v30 = vld [vmem:[%s6779_s27 + $0x1c] sm:$0xf]  ;;  %v5350_v55 = vld [vmem:[%s6779_s27 + $0x70] sm:$0xf] }
  0x46   : > { %6228 = vmatpush3.bf16.msra.mxu0 %v6897_v60  ;;  %6199 = vmatprep.mubr.msk.bf16.mxu0 %vm307_vm0, %v5441_v22  ;;  %v586_v3 = vrot.slane %v585_v47, 4  ;;  %v608_v4 = vrot.slane %v606_v53, 4  ;;  %v5430_v6 = vrot.slane %v5414_v26, 9  ;;  %v5444_v8 = vcombine.low %v7052_v59, %v7058_v52  ;;  %v7082_v60 = vld [vmem:[%s8407_s1 + $0x70] sm:$0xff]  }
  0x47   : > { %v600_v9 = vrot.slane %v599_v40, 4  ;;  %v614_v25 = vrot.slane %v612_v20, 5  ;;  %v2958_v12 = vrot.slane %v2956_v63, 4  ;;  %6229 = vmatprep.subr.bf16.mxu0 %v6662_v11  ;;  %v2963_v14 = vrot.slane %v6927_v43, 5 }
  0x48   : > { %v591_v13 = vsel %vm6818_vm3, %v586_v3, %v590_v49  ;;  %v609_v31 = vor.u32 %v608_v4, %v604_v58  ;;  %v617_v16 = vshrl.u32 %v523_v2, 16  ;;  %v7094_v22 = vsel %vm6953_vm6, %v5429_v62, %v2956_v63  ;;  %v5415_v49 = vld [vmem:[%s6779_s27 + $0x6c] sm:$0xe] }
  0x49   : > { %v5175_v18 = vcombine.low %v581_v1, %v591_v13  ;;  %v7098_v24 = vsel %vm6953_vm6, %v2958_v12, %v2959_v0  ;;  %v2966_v27 = vrot.slane %v6930_v50, 5  ;;  %v605_v43 = vsel %vm6818_vm3, %v600_v9, %v604_v58  ;;  %v7149_v9 = vld [vmem:[%s8407_s1 + $0x30] sm:$0xff]  }
  0x4a   : > { %v610_v28 = vrot.slane %v609_v31, 4  ;;  %v7105_v33 = vsel %vm6953_vm6, %v5430_v6, %v2963_v14  ;;  %v619_v34 = vrot.slane %v617_v16, 4  ;;  %6230 = vmatpush3.bf16.msra.mxu0 %v6662_v11  ;;  %v620_v35 = vshll.u32 %v523_v2, 16  ;;  %v5353_v2 = vld [vmem:[%s6779_s27 + $0x7c] sm:$0xf] }
  0x4b   : > { %6044 = vmatmul.mubr.msk.bf16.gmra.mrb[28].mxu1 %vm307_vm0, %v6660_v44  ;;  %v626_v38 = vshll.u32 %v7077_v30, 16  ;;  %v630_v39 = vshrl.u32 %v7077_v30, 16  ;;  %v636_v50 = vshll.u32 %v7089_v32, 16  ;;  %6263 = vmatprep.subr.bf16.mxu0 %v7082_v60  ;;  %v5445_v45 = vcombine.low %v7094_v22, %v7098_v24  ;;  %v5416_v31 = vld [vmem:[%s6779_s27 + $0x78] sm:$0xe] }
  0x4c   : > { %6051 = vmatprep.mubr.msk.bf16.mxu1 %vm307_vm0, %v5175_v18  ;;  %v615_v42 = vsel %vm6818_vm3, %v610_v28, %v614_v25  ;;  %v641_v5 = vshrl.u32 %v526_v17, 16  ;;  %v644_v48 = vshll.u32 %v526_v17, 16  ;;  %v2965_v19 = vrot.slane %v2963_v14, 4  ;;  %v7161_v18 = vld [vmem:[%s6779_s27 + $0x80] sm:$0x1] }
  0x4d   : > { %6200 = vmatmul.mubr.msk.bf16.gmra.mrb[4].mxu0 %vm307_vm0, %v5442_v54  ;;  %v5176_v10 = vcombine.low %v605_v43, %v615_v42  ;;  %v622_v11 = vrot.slane %v620_v35, 5  ;;  %v628_v37 = vrot.slane %v626_v38, 5  ;;  %v632_v56 = vrot.slane %v630_v39, 4  ;;  %v529_v22 = vld [vmem:[%s6779_s27 + $0x30] sm:$0xf] }
  0x4e   : > { %6203 = vmatprep.mubr.msk.bf16.mxu0 %vm307_vm0, %v5443_v51  ;;  %v638_v57 = vrot.slane %v636_v50, 5  ;;  %v643_v26 = vrot.slane %v641_v5, 4  ;;  %v646_v44 = vrot.slane %v644_v48, 5  ;;  %v650_v54 = vshll.u32 %v7112_v41, 16  ;;  %v5351_v51 = vld [vmem:[%s6779_s27 + $0x74] sm:$0x1] }
  0x4f   : > { %v623_v15 = vor.u32 %v622_v11, %v619_v34  ;;  %v654_v47 = vshrl.u32 %v7112_v41, 16  ;;  %v660_v58 = vshll.u32 %v7120_v46, 16  ;;  %v633_v23 = vor.u32 %v632_v56, %v628_v37  ;;  %v7185_v50 = vld [vmem:[%s6779_s27 + $0x38] sm:$0x1]  ;;  %v7195_v56 = vld [vmem:[%s6779_s27 + $0x40] sm:$0xf] }
  0x50   : > { %v647_v29 = vor.u32 %v646_v44, %v643_v26  ;;  %v5431_v53 = vrot.slane %v5415_v49, 9  ;;  %v2970_v20 = vrot.slane %v5350_v55, 5  ;;  %v7142_v40 = vsel %vm6953_vm6, %v2965_v19, %v2966_v27 }
  0x51   : > { %v624_v62 = vrot.slane %v623_v15, 4  ;;  %v652_v63 = vrot.slane %v650_v54, 5  ;;  %v656_v0 = vrot.slane %v654_v47, 4  ;;  %v634_v1 = vrot.slane %v633_v23, 4  ;;  %v7202_v15 = vld [vmem:[%s6779_s27 + $0x44] sm:$0x1] }
  0x52   : > { %v648_v3 = vrot.slane %v647_v29, 4  ;;  %v662_v4 = vrot.slane %v660_v58, 5  ;;  %v2972_v6 = vrot.slane %v2970_v20, 4  ;;  %v2973_v12 = vrot.slane %v5351_v51, 5  ;;  %v5417_v29 = vld [vmem:[%s6779_s27 + $0x84] sm:$0xe] }
  0x53   : > { %6052 = vmatmul.mubr.msk.bf16.vlgmr.msra.gmra.mrb[0].mxu1 %vm307_vm0, %v5176_v10  ;;  %v629_v25 = vsel %vm6818_vm3, %v624_v62, %v628_v37  ;;  %v2385_v13 = vshll.u32 %v5353_v2, 16  ;;  %v5446_v14 = vcombine.low %v7105_v33, %v7142_v40  ;;  %v639_v16 = vsel %vm6818_vm3, %v634_v1, %v638_v57  ;;  %v7173_v33 = vld [vmem:[%s6779_s27 + $0x34] sm:$0xf]  ;;  %v532_v10 = vld [vmem:[%s6779_s27 + $0x3c] sm:$0xf] }
  0x54   : > { %6084 = vmatpush3.bf16.msra.mxu1 %v6945_v7  ;;  %v657_v7 = vor.u32 %v656_v0, %v652_v63  ;;  %v2971_v17 = vsel %vm6953_vm6, %v5431_v53, %v2970_v20  ;;  %v5177_v24 = vcombine.low %v629_v25, %v639_v16  ;;  %v653_v27 = vsel %vm6818_vm3, %v648_v3, %v652_v63  ;;  %v5356_v62 = vld [vmem:[%s6779_s27 + $0x88] sm:$0xf]  ;;  %v5357_v63 = vld [vmem:[%s6779_s27 + $0x8c] sm:$0x1] }
  0x55   : > { %6085 = vmatprep.subr.bf16.mxu1 %v6663_v61  ;;  %6204 = vmatmul.mubr.msk.bf16.gmra.mrb[8].mxu0 %vm307_vm0, %v5444_v8  ;;  %v2974_v28 = vsel %vm6953_vm6, %v2972_v6, %v2973_v12  ;;  %v7176_v34 = vrot.slane %v2385_v13, 5  ;;  %v2389_v59 = vshrl.u32 %v5353_v2, 16  ;;  %v5432_v8 = vrot.slane %v5416_v31, 9  ;;  %v5359_v13 = vld [vmem:[%s6779_s27 + $0x94] sm:$0xf] }
  0x56   : > { %v658_v43 = vrot.slane %v657_v7, 4  ;;  %6207 = vmatprep.mubr.msk.bf16.mxu0 %vm307_vm0, %v5445_v45  ;;  %6055 = vmatprep.mubr.msk.bf16.mxu1 %vm307_vm0, %v5177_v24  ;;  %v2977_v38 = vrot.slane %v5353_v2, 5  ;;  %v2980_v39 = vrot.slane %v7161_v18, 5  ;;  %v665_v42 = vshrl.u32 %v529_v22, 16 }
  0x57   : > { %v5447_v5 = vcombine.low %v2971_v17, %v2974_v28  ;;  %v668_v48 = vshll.u32 %v529_v22, 16  ;;  %v674_v55 = vshll.u32 %v7173_v33, 16  ;;  %v678_v49 = vshrl.u32 %v7173_v33, 16  ;;  %v5360_v22 = vld [vmem:[%s6779_s27 + $0x98] sm:$0x1] }
  0x58   : > { %6086 = vmatpush3.bf16.msra.mxu1 %v6663_v61  ;;  %v663_v35 = vsel %vm6818_vm3, %v658_v43, %v662_v4  ;;  %v7191_v19 = vsel %vm6953_vm6, %v5432_v8, %v2977_v38  ;;  %v2979_v11 = vrot.slane %v2977_v38, 4  ;;  %v667_v37 = vrot.slane %v665_v42, 4  ;;  %v5418_v4 = vld [vmem:[%s6779_s27 + $0x90] sm:$0xe]  ;;  %v7226_v42 = vld [vmem:[%s6779_s27 + $0x4c] sm:$0xf] }
  0x59   : > { %6119 = vmatprep.subr.bf16.mxu1 %v7149_v9  ;;  %v5178_v45 = vcombine.low %v653_v27, %v663_v35  ;;  %v7198_v57 = vrot.slane %v2389_v59, 4  ;;  %v670_v26 = vrot.slane %v668_v48, 5  ;;  %v676_v44 = vrot.slane %v674_v55, 5  ;;  %v535_v59 = vld [vmem:[%s6779_s27 + $0x48] sm:$0xf] }
  0x5a   : > { %v684_v61 = vshll.u32 %v7185_v50, 16  ;;  %v2981_v54 = vsel %vm6953_vm6, %v2979_v11, %v2980_v39  ;;  %v680_v47 = vrot.slane %v678_v49, 4  ;;  %v689_v58 = vshrl.u32 %v532_v10, 16  ;;  %v7231_v11 = vld [vmem:[%s6779_s27 + $0x50] sm:$0x1] }
  0x5b   : > { %6056 = vmatmul.mubr.msk.bf16.gmra.mrb[4].mxu1 %vm307_vm0, %v5178_v45  ;;  %v692_v23 = vshll.u32 %v532_v10, 16  ;;  %v5448_v51 = vcombine.low %v7191_v19, %v2981_v54  ;;  %v671_v53 = vor.u32 %v670_v26, %v667_v37  ;;  %v698_v40 = vshll.u32 %v7195_v56, 16 }
  0x5c   : > { %v686_v20 = vrot.slane %v684_v61, 5  ;;  %v681_v0 = vor.u32 %v680_v47, %v676_v44  ;;  %v691_v2 = vrot.slane %v689_v58, 4  ;;  %v702_v3 = vshrl.u32 %v7195_v56, 16  ;;  %v538_v47 = vld [vmem:[%s6779_s27 + $0x54] sm:$0xf] }
  0x5d   : > { %6208 = vmatmul.mubr.msk.bf16.gmra.mrb[12].mxu0 %vm307_vm0, %v5446_v14  ;;  %v694_v1 = vrot.slane %v692_v23, 5  ;;  %v672_v6 = vrot.slane %v671_v53, 4  ;;  %v700_v25 = vrot.slane %v698_v40, 5  ;;  %v708_v7 = vshll.u32 %v7202_v15, 16  ;;  %v7241_v58 = vld [vmem:[%s6779_s27 + $0x58] sm:$0xf] }
  0x5e   : > { %6211 = vmatprep.mubr.msk.bf16.mxu0 %vm307_vm0, %v5447_v5  ;;  %v5433_v12 = vrot.slane %v5417_v29, 9  ;;  %v682_v31 = vrot.slane %v681_v0, 4  ;;  %v704_v14 = vrot.slane %v702_v3, 4  ;;  %v2984_v17 = vrot.slane %v5356_v62, 5  ;;  %v7247_v40 = vld [vmem:[%s6779_s27 + $0x5c] sm:$0x1] }
  0x5f   : > { %v695_v16 = vor.u32 %v694_v1, %v691_v2  ;;  %v677_v24 = vsel %vm6818_vm3, %v672_v6, %v676_v44  ;;  %v710_v27 = vrot.slane %v708_v7, 5  ;;  %v2987_v43 = vrot.slane %v5357_v63, 5  ;;  %v5362_v1 = vld [vmem:[%s6779_s27 + $0xa0] sm:$0xf]  ;;  %v5419_v7 = vld [vmem:[%s6779_s27 + $0x9c] sm:$0xe] }
  0x60   : > { %v5434_v28 = vrot.slane %v5418_v4, 9  ;;  %v687_v8 = vsel %vm6818_vm3, %v682_v31, %v686_v20  ;;  %v705_v38 = vor.u32 %v704_v14, %v700_v25  ;;  %v2985_v39 = vsel %vm6953_vm6, %v5433_v12, %v2984_v17  ;;  %v5365_v14 = vld [vmem:[%s6779_s27 + $0xac] sm:$0xf] }
  0x61   : > { %v696_v35 = vrot.slane %v695_v16, 4  ;;  %v5179_v45 = vcombine.low %v677_v24, %v687_v8  ;;  %v2986_v5 = vrot.slane %v2984_v17, 4  ;;  %v2991_v48 = vrot.slane %v5359_v13, 5 }
  0x62   : > { %v2994_v55 = vrot.slane %v5360_v22, 5  ;;  %v706_v19 = vrot.slane %v705_v38, 4  ;;  %v713_v37 = vshrl.u32 %v535_v59, 16  ;;  %v716_v49 = vshll.u32 %v535_v59, 16  ;;  %v5420_v38 = vld [vmem:[%s6779_s27 + $0xa8] sm:$0xe] }
  0x63   : > { %v701_v10 = vsel %vm6818_vm3, %v696_v35, %v700_v25  ;;  %6059 = vmatprep.mubr.msk.bf16.mxu1 %vm307_vm0, %v5179_v45  ;;  %v2988_v26 = vsel %vm6953_vm6, %v2986_v5, %v2987_v43  ;;  %v2992_v44 = vsel %vm6953_vm6, %v5434_v28, %v2991_v48  ;;  %v2993_v61 = vrot.slane %v2991_v48, 4  ;;  %v5363_v25 = vld [vmem:[%s6779_s27 + $0xa4] sm:$0x1]  ;;  %v5366_v43 = vld [vmem:[%s6779_s27 + $0xb0] sm:$0x1] }
  0x64   : > { %v722_v54 = vshll.u32 %v7226_v42, 16  ;;  %v711_v23 = vsel %vm6818_vm3, %v706_v19, %v710_v27  ;;  %v5449_v29 = vcombine.low %v2985_v39, %v2988_v26  ;;  %v715_v53 = vrot.slane %v713_v37, 4  ;;  %v7268_v26 = vld [vmem:[%s6779_s27 + $0x64] sm:$0xf] }
  0x65   : > { %6212 = vmatmul.mubr.msk.bf16.gmra.mrb[16].mxu0 %vm307_vm0, %v5448_v51  ;;  %v718_v20 = vrot.slane %v716_v49, 5  ;;  %v5180_v62 = vcombine.low %v701_v10, %v711_v23  ;;  %v2995_v63 = vsel %vm6953_vm6, %v2993_v61, %v2994_v55  ;;  %v726_v2 = vshrl.u32 %v7226_v42, 16  ;;  %v541_v55 = vld [vmem:[%s6779_s27 + $0x60] sm:$0xf] }
  0x66   : > { %v724_v0 = vrot.slane %v722_v54, 5  ;;  %6215 = vmatprep.mubr.msk.bf16.mxu0 %vm307_vm0, %v5449_v29  ;;  %v5450_v51 = vcombine.low %v2992_v44, %v2995_v63  ;;  %v732_v4 = vshll.u32 %v7231_v11, 16  ;;  %v737_v6 = vshrl.u32 %v538_v47, 16 }
  0x67   : > { %v719_v3 = vor.u32 %v718_v20, %v715_v53  ;;  %6060 = vmatmul.mubr.msk.bf16.gmra.mrb[8].mxu1 %vm307_vm0, %v5180_v62  ;;  %v728_v12 = vrot.slane %v726_v2, 4  ;;  %v740_v13 = vshll.u32 %v538_v47, 16  ;;  %v746_v31 = vshll.u32 %v7241_v58, 16 }
  0x68   : > { %v750_v16 = vshrl.u32 %v7241_v58, 16  ;;  %v734_v22 = vrot.slane %v732_v4, 5  ;;  %v739_v24 = vrot.slane %v737_v6, 4  ;;  %v756_v27 = vshll.u32 %v7247_v40, 16 }
  0x69   : > { %v720_v17 = vrot.slane %v719_v3, 4  ;;  %v729_v28 = vor.u32 %v728_v12, %v724_v0  ;;  %v742_v59 = vrot.slane %v740_v13, 5  ;;  %v748_v8 = vrot.slane %v746_v31, 5 }
  0x6a   : > { %v752_v35 = vrot.slane %v750_v16, 4  ;;  %v758_v45 = vrot.slane %v756_v27, 5  ;;  %v5435_v5 = vrot.slane %v5419_v7, 9  ;;  %v2998_v48 = vrot.slane %v5362_v1, 5  ;;  %v7280_v1 = vld [vmem:[%s6779_s27 + $0x68] sm:$0x1] }
  0x6b   : > { %v725_v39 = vsel %vm6818_vm3, %v720_v17, %v724_v0  ;;  %v730_v10 = vrot.slane %v729_v28, 4  ;;  %v743_v19 = vor.u32 %v742_v59, %v739_v24  ;;  %v3001_v49 = vrot.slane %v5363_v25, 5  ;;  %v544_v25 = vld [vmem:[%s6779_s27 + $0x6c] sm:$0xf]  ;;  %v7292_v16 = vld [vmem:[%s6779_s27 + $0x70] sm:$0xf] }
  0x6c   : > { %v753_v37 = vor.u32 %v752_v35, %v748_v8  ;;  %v2999_v44 = vsel %vm6953_vm6, %v5435_v5, %v2998_v48  ;;  %v3000_v61 = vrot.slane %v2998_v48, 4  ;;  %v5436_v54 = vrot.slane %v5420_v38, 9  ;;  %v5421_v28 = vld [vmem:[%s6779_s27 + $0xb4] sm:$0xe] }
  0x6d   : > { %6216 = vmatmul.mubr.msk.bf16.gmra.mrb[20].mxu0 %vm307_vm0, %v5450_v51  ;;  %v3005_v47 = vrot.slane %v5365_v14, 5  ;;  %v735_v23 = vsel %vm6818_vm3, %v730_v10, %v734_v22  ;;  %v744_v29 = vrot.slane %v743_v19, 4  ;;  %v3008_v20 = vrot.slane %v5366_v43, 5  ;;  %v7295_v14 = vld [vmem:[%s6779_s27 + $0x74] sm:$0x1] }
  0x6e   : > { %v754_v53 = vrot.slane %v753_v37, 4  ;;  %v5181_v62 = vcombine.low %v725_v39, %v735_v23  ;;  %v3002_v63 = vsel %vm6953_vm6, %v3000_v61, %v3001_v49  ;;  %v761_v6 = vshrl.u32 %v541_v55, 16  ;;  %v5368_v43 = vld [vmem:[%s6779_s27 + $0xb8] sm:$0xf]  ;;  %v5369_v39 = vld [vmem:[%s6779_s27 + $0xbc] sm:$0x1] }
  0x6f   : > { %v3006_v0 = vsel %vm6953_vm6, %v5436_v54, %v3005_v47  ;;  %v3007_v2 = vrot.slane %v3005_v47, 4  ;;  %v749_v51 = vsel %vm6818_vm3, %v744_v29, %v748_v8  ;;  %v5451_v4 = vcombine.low %v2999_v44, %v3002_v63  ;;  %v5371_v61 = vld [vmem:[%s6779_s27 + $0xc4] sm:$0xf] }
  0x70   : > { %v759_v3 = vsel %vm6818_vm3, %v754_v53, %v758_v45  ;;  %6063 = vmatprep.mubr.msk.bf16.mxu1 %vm307_vm0, %v5181_v62  ;;  %v764_v13 = vshll.u32 %v541_v55, 16  ;;  %v770_v31 = vshll.u32 %v7268_v26, 16  ;;  %v763_v22 = vrot.slane %v761_v6, 4  ;;  %v5422_v45 = vld [vmem:[%s6779_s27 + $0xc0] sm:$0xe] }
  0x71   : > { %v5182_v7 = vcombine.low %v749_v51, %v759_v3  ;;  %v3009_v12 = vsel %vm6953_vm6, %v3007_v2, %v3008_v20  ;;  %6219 = vmatprep.mubr.msk.bf16.mxu0 %vm307_vm0, %v5451_v4  ;;  %v774_v24 = vshrl.u32 %v7268_v26, 16  ;;  %v780_v27 = vshll.u32 %v7280_v1, 16  ;;  %v547_v6 = vld [vmem:[%s6779_s27 + $0x78] sm:$0xf] }
  0x72   : > { %v5452_v17 = vcombine.low %v3006_v0, %v3009_v12  ;;  %v766_v59 = vrot.slane %v764_v13, 5  ;;  %v772_v8 = vrot.slane %v770_v31, 5  ;;  %v785_v35 = vshrl.u32 %v544_v25, 16  ;;  %v5372_v0 = vld [vmem:[%s6779_s27 + $0xc8] sm:$0x1] }
  0x73   : > { %6064 = vmatmul.mubr.msk.bf16.gmra.mrb[12].mxu1 %vm307_vm0, %v5182_v7  ;;  %v788_v38 = vshll.u32 %v544_v25, 16  ;;  %v776_v5 = vrot.slane %v774_v24, 4  ;;  %v782_v48 = vrot.slane %v780_v27, 5  ;;  %v794_v55 = vshll.u32 %v7292_v16, 16  ;;  %v7317_v31 = vld [vmem:[%s6779_s27 + $0x7c] sm:$0xf] }
  0x74   : > { %v798_v10 = vshrl.u32 %v7292_v16, 16  ;;  %v767_v19 = vor.u32 %v766_v59, %v763_v22  ;;  %v787_v37 = vrot.slane %v785_v35, 4  ;;  %v804_v44 = vshll.u32 %v7295_v14, 16 }
  0x75   : > { %6220 = vmatmul.mubr.msk.bf16.gmra.mrb[24].mxu0 %vm307_vm0, %v5452_v17  ;;  %v790_v49 = vrot.slane %v788_v38, 5  ;;  %v777_v54 = vor.u32 %v776_v5, %v772_v8  ;;  %v796_v47 = vrot.slane %v794_v55, 5  ;;  %v5437_v29 = vrot.slane %v5421_v28, 9  ;;  %v7320_v17 = vld [vmem:[%s6779_s27 + $0x80] sm:$0x1] }
  0x76   : > { %v800_v23 = vrot.slane %v798_v10, 4  ;;  %v768_v53 = vrot.slane %v767_v19, 4  ;;  %v806_v62 = vrot.slane %v804_v44, 5  ;;  %v3012_v63 = vrot.slane %v5368_v43, 5  ;;  %v550_v28 = vld [vmem:[%s6779_s27 + $0x84] sm:$0xf] }
  0x77   : > { %v791_v20 = vor.u32 %v790_v49, %v787_v37  ;;  %v778_v2 = vrot.slane %v777_v54, 4  ;;  %v3015_v3 = vrot.slane %v5369_v39, 5  ;;  %v5438_v4 = vrot.slane %v5422_v45, 9  ;;  %v7330_v39 = vld [vmem:[%s6779_s27 + $0x88] sm:$0xf] }
  0x78   : > { %v801_v51 = vor.u32 %v800_v23, %v796_v47  ;;  %v773_v25 = vsel %vm6818_vm3, %v768_v53, %v772_v8  ;;  %v3013_v12 = vsel %vm6953_vm6, %v5437_v29, %v3012_v63  ;;  %v3014_v13 = vrot.slane %v3012_v63, 4  ;;  %v7337_v10 = vld [vmem:[%s6779_s27 + $0x8c] sm:$0x1]  ;;  %v6664_v29 = vld [vmem:[%s6779_s27 + $0x18] sm:$0xff]   ;;  %v553_v53 = vld [vmem:[%s6779_s27 + $0x90] sm:$0xf] }
  0x79   : > { %v792_v7 = vrot.slane %v791_v20, 4  ;;  %v783_v22 = vsel %vm6818_vm3, %v778_v2, %v782_v48  ;;  %v3019_v27 = vrot.slane %v5371_v61, 5  ;;  %v3022_v43 = vrot.slane %v5372_v0, 5  ;;  %v7350_v2 = vld [vmem:[%s6779_s27 + $0x94] sm:$0xf] }
  0x7a   : > { %v802_v24 = vrot.slane %v801_v51, 4  ;;  %v5183_v59 = vcombine.low %v773_v25, %v783_v22  ;;  %v3016_v35 = vsel %vm6953_vm6, %v3014_v13, %v3015_v3  ;;  %v809_v38 = vshrl.u32 %v547_v6, 16  ;;  %v7357_v22 = vld [vmem:[%s6779_s27 + $0x98] sm:$0x1] }
  0x7b   : > { %v797_v8 = vsel %vm6818_vm3, %v792_v7, %v796_v47  ;;  %v5453_v5 = vcombine.low %v3013_v12, %v3016_v35  ;;  %v3020_v48 = vsel %vm6953_vm6, %v5438_v4, %v3019_v27  ;;  %v3021_v55 = vrot.slane %v3019_v27, 4 }
  0x7c   : > { %v807_v45 = vsel %vm6818_vm3, %v802_v24, %v806_v62  ;;  %6067 = vmatprep.mubr.msk.bf16.mxu1 %vm307_vm0, %v5183_v59  ;;  %v811_v37 = vrot.slane %v809_v38, 4  ;;  %v812_v49 = vshll.u32 %v547_v6, 16  ;;  %v818_v44 = vshll.u32 %v7317_v31, 16 }
  0x7d   : > { %v5184_v19 = vcombine.low %v797_v8, %v807_v45  ;;  %6223 = vmatprep.mubr.msk.bf16.mxu0 %vm307_vm0, %v5453_v5  ;;  %v3023_v61 = vsel %vm6953_vm6, %v3021_v55, %v3022_v43  ;;  %v822_v54 = vshrl.u32 %v7317_v31, 16  ;;  %v828_v47 = vshll.u32 %v7320_v17, 16  ;;  %v6666_v45 = vld [vmem:[%s6779_s27 + $0x24] sm:$0xff]   ;;  %v556_v5 = vld [vmem:[%s6779_s27 + $0x9c] sm:$0xf] }
  0x7e   : > { %v833_v23 = vshrl.u32 %v550_v28, 16  ;;  %v5454_v20 = vcombine.low %v3020_v48, %v3023_v61  ;;  %v814_v62 = vrot.slane %v812_v49, 5  ;;  %v820_v63 = vrot.slane %v818_v44, 5  ;;  %v6667_v49 = vld [vmem:[%s6779_s27 + $0x30] sm:$0xff]  }
  0x7f   : > { %6068 = vmatmul.mubr.msk.bf16.gmra.mrb[16].mxu1 %vm307_vm0, %v5184_v19  ;;  %v836_v0 = vshll.u32 %v550_v28, 16  ;;  %v824_v51 = vrot.slane %v822_v54, 4  ;;  %v830_v3 = vrot.slane %v828_v47, 5  ;;  %v842_v6 = vshll.u32 %v7330_v39, 16 }
  0x80   : > { %v835_v4 = vrot.slane %v833_v23, 4  ;;  %6224 = vmatmul.mubr.msk.bf16.gmra.mrb[28].mxu0 %vm307_vm0, %v5454_v20  ;;  %v815_v25 = vor.u32 %v814_v62, %v811_v37  ;;  %v846_v12 = vshrl.u32 %v7330_v39, 16  ;;  %v852_v13 = vshll.u32 %v7337_v10, 16  ;;  %v7368_v23 = vld [vmem:[%s6779_s27 + $0xa0] sm:$0xf] }
  0x81   : > { %v838_v7 = vrot.slane %v836_v0, 5  ;;  %v825_v24 = vor.u32 %v824_v51, %v820_v63  ;;  %v844_v27 = vrot.slane %v842_v6, 5  ;;  %6231 = vmatprep.mubr.msk.bf16.mxu0 %vm307_vm0, %v6664_v29  ;;  %v857_v43 = vshrl.u32 %v553_v53, 16  ;;  %v6675_v29 = vld [vmem:[%s8407_s1 + $0x78] sm:$0xff]   ;;  %v7377_v51 = vld [vmem:[%s6779_s27 + $0xa4] sm:$0x1] }
  0x82   : > { %v860_v28 = vshll.u32 %v553_v53, 16  ;;  %v816_v59 = vrot.slane %v815_v25, 4  ;;  %v848_v35 = vrot.slane %v846_v12, 4  ;;  %v854_v38 = vrot.slane %v852_v13, 5  ;;  %v7383_v12 = vld [vmem:[%s6779_s27 + $0xac] sm:$0xf] }
  0x83   : > { %v839_v8 = vor.u32 %v838_v7, %v835_v4  ;;  %v826_v48 = vrot.slane %v825_v24, 4  ;;  %v859_v55 = vrot.slane %v857_v43, 4  ;;  %v866_v37 = vshll.u32 %v7350_v2, 16  ;;  %v559_v7 = vld [vmem:[%s6779_s27 + $0xa8] sm:$0xf] }
  0x84   : > { %v862_v19 = vrot.slane %v860_v28, 5  ;;  %v821_v44 = vsel %vm6818_vm3, %v816_v59, %v820_v63  ;;  %v849_v54 = vor.u32 %v848_v35, %v844_v27  ;;  %v870_v47 = vshrl.u32 %v7350_v2, 16 }
  0x85   : > { %v840_v61 = vrot.slane %v839_v8, 4  ;;  %v831_v53 = vsel %vm6818_vm3, %v826_v48, %v830_v3  ;;  %v868_v62 = vrot.slane %v866_v37, 5  ;;  %v876_v0 = vshll.u32 %v7357_v22, 16 }
  0x86   : > { %v863_v20 = vor.u32 %v862_v19, %v859_v55  ;;  %v5185_v63 = vcombine.low %v821_v44, %v831_v53  ;;  %v850_v6 = vrot.slane %v849_v54, 4  ;;  %v872_v25 = vrot.slane %v870_v47, 4 }
  0x87   : > { %v845_v4 = vsel %vm6818_vm3, %v840_v61, %v844_v27  ;;  %v878_v24 = vrot.slane %v876_v0, 5  ;;  %v881_v43 = vshrl.u32 %v556_v5, 16  ;;  %v884_v3 = vshll.u32 %v556_v5, 16  ;;  %v562_v61 = vld [vmem:[%s6779_s27 + $0xb4] sm:$0xf] }
  0x88   : > { %v864_v13 = vrot.slane %v863_v20, 4  ;;  %6071 = vmatprep.mubr.msk.bf16.mxu1 %vm307_vm0, %v5185_v63  ;;  %v855_v28 = vsel %vm6818_vm3, %v850_v6, %v854_v38  ;;  %6232 = vmatmul.mubr.msk.bf16.vlgmr.msra.gmra.mrb[0].mxu0 %vm307_vm0, %v6666_v45  ;;  %v873_v59 = vor.u32 %v872_v25, %v868_v62  ;;  %v890_v27 = vshll.u32 %v7368_v23, 16  ;;  %v7396_v38 = vld [vmem:[%s6779_s27 + $0xb0] sm:$0x1]  ;;  %v7401_v45 = vld [vmem:[%s8407_s1 + $0x80] sm:$0xff]  }
  0x89   : > { %v894_v8 = vshrl.u32 %v7368_v23, 16  ;;  %v5186_v35 = vcombine.low %v845_v4, %v855_v28  ;;  %6264 = vmatpush3.bf16.msra.mxu0 %v7082_v60  ;;  %v883_v48 = vrot.slane %v881_v43, 4  ;;  %v886_v55 = vrot.slane %v884_v3, 5  ;;  %6235 = vmatprep.mubr.msk.bf16.mxu0 %vm307_vm0, %v6667_v49  ;;  %v6668_v49 = vld [vmem:[%s6779_s27 + $0x3c] sm:$0xff]  }
  0x8a   : > { %v869_v5 = vsel %vm6818_vm3, %v864_v13, %v868_v62  ;;  %v874_v19 = vrot.slane %v873_v59, 4  ;;  %v892_v37 = vrot.slane %v890_v27, 5  ;;  %v900_v60 = vshll.u32 %v7377_v51, 16  ;;  %6265 = vmatprep.subr.bf16.mxu0 %v6675_v29  ;;  %v7409_v62 = vld [vmem:[%s6779_s27 + $0xb8] sm:$0xf]  ;;  %v6669_v59 = vld [vmem:[%s6779_s27 + $0x48] sm:$0xff]  }
  0x8b   : > { %v896_v44 = vrot.slane %v894_v8, 4  ;;  %6072 = vmatmul.mubr.msk.bf16.gmra.mrb[20].mxu1 %vm307_vm0, %v5186_v35  ;;  %v887_v54 = vor.u32 %v886_v55, %v883_v48  ;;  %v905_v47 = vshrl.u32 %v559_v7, 16  ;;  %v908_v53 = vshll.u32 %v559_v7, 16  ;;  %v7415_v28 = vld [vmem:[%s6779_s27 + $0xbc] sm:$0x1] }
  0x8c   : > { %v914_v20 = vshll.u32 %v7383_v12, 16  ;;  %v879_v0 = vsel %vm6818_vm3, %v874_v19, %v878_v24  ;;  %v902_v4 = vrot.slane %v900_v60, 5  ;;  %v918_v6 = vshrl.u32 %v7383_v12, 16  ;;  %v1257_v48 = vld [vmem:[%s6779_s27] sm:$0xe] }
  0x8d   : > { %v897_v63 = vor.u32 %v896_v44, %v892_v37  ;;  %v5187_v25 = vcombine.low %v869_v5, %v879_v0  ;;  %v888_v13 = vrot.slane %v887_v54, 4  ;;  %v907_v43 = vrot.slane %v905_v47, 4  ;;  %6266 = vmatpush3.bf16.msra.mxu0 %v6675_v29 }
  0x8e   : > { %v910_v3 = vrot.slane %v908_v53, 5  ;;  %v916_v27 = vrot.slane %v914_v20, 5  ;;  %v920_v8 = vrot.slane %v918_v6, 4  ;;  %v924_v35 = vshll.u32 %v7396_v38, 16  ;;  %6299 = vmatprep.subr.bf16.mxu0 %v7401_v45  ;;  %v6670_v6 = vld [vmem:[%s6779_s27 + $0x54] sm:$0xff]  }
  0x8f   : > { %v898_v7 = vrot.slane %v897_v63, 4  ;;  %6075 = vmatprep.mubr.msk.bf16.mxu1 %vm307_vm0, %v5187_v25  ;;  %v893_v24 = vsel %vm6818_vm3, %v888_v13, %v892_v37  ;;  %v929_v55 = vshrl.u32 %v562_v61, 16  ;;  %v932_v19 = vshll.u32 %v562_v61, 16  ;;  %v1258_v37 = vld [vmem:[%s6779_s27 + $0xc] sm:$0xe] }
  0x90   : > { %v911_v5 = vor.u32 %v910_v3, %v907_v43  ;;  %6236 = vmatmul.mubr.msk.bf16.gmra.mrb[4].mxu0 %vm307_vm0, %v6668_v49  ;;  %v921_v44 = vor.u32 %v920_v8, %v916_v27  ;;  %v926_v60 = vrot.slane %v924_v35, 5  ;;  %v938_v54 = vshll.u32 %v7409_v62, 16  ;;  %v1259_v25 = vld [vmem:[%s6779_s27 + $0x18] sm:$0xe] }
  0x91   : > { %v903_v29 = vsel %vm6818_vm3, %v898_v7, %v902_v4  ;;  %v931_v20 = vrot.slane %v929_v55, 4  ;;  %v934_v0 = vrot.slane %v932_v19, 5  ;;  %6239 = vmatprep.mubr.msk.bf16.mxu0 %vm307_vm0, %v6669_v59  ;;  %v942_v4 = vshrl.u32 %v7409_v62, 16  ;;  %v6702_v59 = vld [vmem:[%s6779_s27 + $0x4] sm:$0xf] }
  0x92   : > { %v5188_v47 = vcombine.low %v893_v24, %v903_v29  ;;  %v912_v53 = vrot.slane %v911_v5, 4  ;;  %v922_v61 = vrot.slane %v921_v44, 4  ;;  %v940_v63 = vrot.slane %v938_v54, 5  ;;  %v6703_v5 = vld [vmem:[%s6779_s27 + $0x8] sm:$0x1]  ;;  %v6671_v19 = vld [vmem:[%s6779_s27 + $0x60] sm:$0xff]  }
  0x93   : > { %v948_v49 = vshll.u32 %v7415_v28, 16  ;;  %v935_v43 = vor.u32 %v934_v0, %v931_v20  ;;  %v5209_v3 = vrot.slane %v1257_v48, 9  ;;  %v1326_v7 = vrot.slane %v6702_v59, 5  ;;  %v1260_v29 = vld [vmem:[%s6779_s27 + $0x24] sm:$0xe] }
  0x94   : > { %6076 = vmatmul.mubr.msk.bf16.gmra.mrb[24].mxu1 %vm307_vm0, %v5188_v47  ;;  %v917_v13 = vsel %vm6818_vm3, %v912_v53, %v916_v27  ;;  %v927_v8 = vsel %vm6818_vm3, %v922_v61, %v926_v60  ;;  %v944_v35 = vrot.slane %v942_v4, 4  ;;  %v1329_v55 = vrot.slane %v6703_v5, 5  ;;  %v6704_v20 = vld [vmem:[%s6779_s27 + $0x10] sm:$0xf]  ;;  %v6705_v59 = vld [vmem:[%s6779_s27 + $0x14] sm:$0x1] }
  0x95   : > { %v950_v24 = vrot.slane %v948_v49, 5  ;;  %v5189_v44 = vcombine.low %v917_v13, %v927_v8  ;;  %v936_v54 = vrot.slane %v935_v43, 4  ;;  %v1327_v27 = vsel %vm6953_vm6, %v5209_v3, %v1326_v7  ;;  %v1262_v8 = vld [vmem:[%s6779_s27 + $0x3c] sm:$0xe] }
  0x96   : > { %v1328_v47 = vrot.slane %v1326_v7, 4  ;;  %v945_v48 = vor.u32 %v944_v35, %v940_v63  ;;  %v5210_v53 = vrot.slane %v1258_v37, 9  ;;  %v1333_v0 = vrot.slane %v6704_v20, 5  ;;  %v1261_v7 = vld [vmem:[%s6779_s27 + $0x30] sm:$0xe] }
  0x97   : > { %v1336_v52 = vrot.slane %v6705_v59, 5  ;;  %6079 = vmatprep.mubr.msk.bf16.mxu1 %vm307_vm0, %v5189_v44  ;;  %v941_v60 = vsel %vm6818_vm3, %v936_v54, %v940_v63  ;;  %v5211_v4 = vrot.slane %v1259_v25, 9  ;;  %v1340_v49 = vrot.slane %v7077_v30, 5 }
  0x98   : > { %v1330_v61 = vsel %vm6953_vm6, %v1328_v47, %v1329_v55  ;;  %v946_v13 = vrot.slane %v945_v48, 4  ;;  %6240 = vmatmul.mubr.msk.bf16.gmra.mrb[8].mxu0 %vm307_vm0, %v6670_v6  ;;  %v7456_v43 = vsel %vm6953_vm6, %v5210_v53, %v1333_v0  ;;  %v1335_v3 = vrot.slane %v1333_v0, 4  ;;  %v6672_v47 = vld [vmem:[%s6779_s27 + $0x6c] sm:$0xff]  }
  0x99   : > { %v5225_v37 = vcombine.low %v1327_v27, %v1330_v61  ;;  %6243 = vmatprep.mubr.msk.bf16.mxu0 %vm307_vm0, %v6671_v19  ;;  %v7462_v63 = vsel %vm6953_vm6, %v5211_v4, %v1340_v49  ;;  %v1342_v25 = vrot.slane %v1340_v49, 4  ;;  %v1343_v30 = vrot.slane %v7089_v32, 5 }
  0x9a   : > { %v5212_v6 = vrot.slane %v1260_v29, 9  ;;  %v951_v35 = vsel %vm6818_vm3, %v946_v13, %v950_v24  ;;  %v1337_v5 = vsel %vm6953_vm6, %v1335_v3, %v1336_v52  ;;  %v1347_v55 = vrot.slane %v7112_v41, 5  ;;  %v1263_v29 = vld [vmem:[%s6779_s27 + $0x48] sm:$0xe]  ;;  %v6674_v41 = vld [vmem:[%s6779_s27 + $0x78] sm:$0xff]  }
  0x9b   : > { %v1350_v19 = vrot.slane %v7120_v46, 5  ;;  %v5190_v44 = vcombine.low %v941_v60, %v951_v35  ;;  %v5226_v54 = vcombine.low %v7456_v43, %v1337_v5  ;;  %v1344_v32 = vsel %vm6953_vm6, %v1342_v25, %v1343_v30  ;;  %v1264_v60 = vld [vmem:[%s6779_s27 + $0x54] sm:$0xe] }
  0x9c   : > { %v5213_v27 = vrot.slane %v1261_v7, 9  ;;  %v5227_v48 = vcombine.low %v7462_v63, %v1344_v32  ;;  %v7480_v24 = vsel %vm6953_vm6, %v5212_v6, %v1347_v55  ;;  %v1349_v52 = vrot.slane %v1347_v55, 4  ;;  %v1265_v63 = vld [vmem:[%s6779_s27 + $0x60] sm:$0xe]  ;;  %v1266_v6 = vld [vmem:[%s6779_s27 + $0x6c] sm:$0xe] }
  0x9d   : > { %v1354_v46 = vrot.slane %v7173_v33, 5  ;;  %6080 = vmatmul.mubr.msk.bf16.gmra.mrb[28].mxu1 %vm307_vm0, %v5190_v44  ;;  %v1357_v53 = vrot.slane %v7185_v50, 5  ;;  %v5214_v20 = vrot.slane %v1262_v8, 9  ;;  %v1361_v0 = vrot.slane %v7195_v56, 5 }
  0x9e   : > { %v1364_v59 = vrot.slane %v7202_v15, 5  ;;  %6087 = vmatprep.mubr.msk.bf16.mxu1 %vm307_vm0, %v5225_v37  ;;  %v7492_v61 = vsel %vm6953_vm6, %v1349_v52, %v1350_v19  ;;  %v5215_v49 = vrot.slane %v1263_v29, 9  ;;  %v1368_v13 = vrot.slane %v7226_v42, 5  ;;  %v1267_v29 = vld [vmem:[%s6779_s27 + $0x78] sm:$0xe]  ;;  %v6677_v52 = vld [vmem:[%s6779_s27 + $0x90] sm:$0xff]  }
  0x9f   : > { %v7496_v33 = vsel %vm6953_vm6, %v5213_v27, %v1354_v46  ;;  %v1356_v4 = vrot.slane %v1354_v46, 4  ;;  %v5228_v50 = vcombine.low %v7480_v24, %v7492_v61  ;;  %v7502_v56 = vsel %vm6953_vm6, %v5214_v20, %v1361_v0  ;;  %v6683_v27 = vld [vmem:[%s8407_s1 + $0x38] sm:$0xff]  }
  0xa0   : > { %v1363_v15 = vrot.slane %v1361_v0, 4  ;;  %6244 = vmatmul.mubr.msk.bf16.gmra.mrb[12].mxu0 %vm307_vm0, %v6672_v47  ;;  %v1371_v43 = vrot.slane %v7231_v11, 5  ;;  %v5216_v3 = vrot.slane %v1264_v60, 9  ;;  %v1375_v7 = vrot.slane %v7241_v58, 5  ;;  %v6676_v47 = vld [vmem:[%s6779_s27 + $0x84] sm:$0xff]  }
  0xa1   : > { %v7508_v37 = vsel %vm6953_vm6, %v1356_v4, %v1357_v53  ;;  %6247 = vmatprep.mubr.msk.bf16.mxu0 %vm307_vm0, %v6674_v41  ;;  %v7522_v30 = vsel %vm6953_vm6, %v5215_v49, %v1368_v13  ;;  %v1370_v11 = vrot.slane %v1368_v13, 4  ;;  %v1378_v5 = vrot.slane %v7247_v40, 5  ;;  %v5539_v60 = vld [vmem:[%s6779_s27 + $0x18] sm:$0xf]  ;;  %v7562_v4 = vld [vmem:[%s6779_s27 + $0x1c] sm:$0xf] }
  0xa2   : > { %v5229_v25 = vcombine.low %v7496_v33, %v7508_v37  ;;  %v7518_v42 = vsel %vm6953_vm6, %v1363_v15, %v1364_v59  ;;  %v7529_v8 = vsel %vm6953_vm6, %v5216_v3, %v1375_v7  ;;  %v1377_v35 = vrot.slane %v1375_v7, 4  ;;  %v7572_v13 = vld [vmem:[%s6779_s27 + $0x20] sm:$0x1] }
  0xa3   : > { %v5230_v58 = vcombine.low %v7502_v56, %v7518_v42  ;;  %v7534_v55 = vsel %vm6953_vm6, %v1370_v11, %v1371_v43  ;;  %v5217_v19 = vrot.slane %v1265_v63, 9  ;;  %v1382_v44 = vrot.slane %v7268_v26, 5  ;;  %v5551_v42 = vld [vmem:[%s6779_s27 + $0x48] sm:$0xf] }
  0xa4   : > { %v1385_v32 = vrot.slane %v7280_v1, 5  ;;  %v5231_v40 = vcombine.low %v7522_v30, %v7534_v55  ;;  %v7548_v41 = vsel %vm6953_vm6, %v1377_v35, %v1378_v5  ;;  %v5218_v46 = vrot.slane %v1266_v6, 9  ;;  %v1268_v1 = vld [vmem:[%s6779_s27 + $0x84] sm:$0xe]  ;;  %v6678_v35 = vld [vmem:[%s6779_s27 + $0x9c] sm:$0xff]  }
  0xa5   : > { %v1389_v26 = vrot.slane %v7292_v16, 5  ;;  %6088 = vmatmul.mubr.msk.bf16.vlgmr.msra.gmra.mrb[0].mxu1 %vm307_vm0, %v5226_v54  ;;  %v5232_v53 = vcombine.low %v7529_v8, %v7548_v41  ;;  %v7557_v20 = vsel %vm6953_vm6, %v5217_v19, %v1382_v44  ;;  %v1384_v0 = vrot.slane %v1382_v44, 4  ;;  %v7702_v55 = vld [vmem:[%s6779_s27 + $0x44] sm:$0x1] }
  0xa6   : > { %v1392_v59 = vrot.slane %v7295_v14, 5  ;;  %6091 = vmatprep.mubr.msk.bf16.mxu1 %vm307_vm0, %v5227_v48  ;;  %6120 = vmatpush3.bf16.msra.mxu1 %v7149_v9  ;;  %v5219_v49 = vrot.slane %v1267_v29, 9  ;;  %v1396_v15 = vrot.slane %v7317_v31, 5  ;;  %v1399_v48 = vrot.slane %v7320_v17, 5  ;;  %v5542_v29 = vld [vmem:[%s6779_s27 + $0x24] sm:$0xf] }
  0xa7   : > { %v7568_v16 = vsel %vm6953_vm6, %v5218_v46, %v1389_v26  ;;  %v1391_v54 = vrot.slane %v1389_v26, 4  ;;  %v7576_v14 = vsel %vm6953_vm6, %v1384_v0, %v1385_v32  ;;  %6121 = vmatprep.subr.bf16.mxu1 %v6683_v27  ;;  %v5220_v43 = vrot.slane %v1268_v1, 9  ;;  %v7615_v26 = vld [vmem:[%s6779_s27 + $0x28] sm:$0xf]  ;;  %v7623_v1 = vld [vmem:[%s8407_s1 + $0x40] sm:$0xff]  }
  0xa8   : > { %v1403_v9 = vrot.slane %v7330_v39, 5  ;;  %6248 = vmatmul.mubr.msk.bf16.gmra.mrb[16].mxu0 %vm307_vm0, %v6676_v47  ;;  %v5233_v3 = vcombine.low %v7557_v20, %v7576_v14  ;;  %v7589_v7 = vsel %vm6953_vm6, %v5219_v49, %v1396_v15  ;;  %v1398_v63 = vrot.slane %v1396_v15, 4  ;;  %v6679_v0 = vld [vmem:[%s6779_s27 + $0xa8] sm:$0xff]   ;;  %v1269_v15 = vld [vmem:[%s6779_s27 + $0x90] sm:$0xe] }
  0xa9   : > { %v7585_v31 = vsel %vm6953_vm6, %v1391_v54, %v1392_v59  ;;  %6251 = vmatprep.mubr.msk.bf16.mxu0 %vm307_vm0, %v6677_v52  ;;  %v1406_v6 = vrot.slane %v7337_v10, 5  ;;  %v3748_v19 = vshrl.u32 %v5539_v60, 16  ;;  %v3751_v44 = vshll.u32 %v5539_v60, 16  ;;  %v7736_v20 = vld [vmem:[%s6779_s27 + $0x4c] sm:$0xf] }
  0xaa   : > { %v5234_v17 = vcombine.low %v7568_v16, %v7585_v31  ;;  %v7596_v39 = vsel %vm6953_vm6, %v5220_v43, %v1403_v9  ;;  %v1405_v11 = vrot.slane %v1403_v9, 4  ;;  %v7602_v5 = vsel %vm6953_vm6, %v1398_v63, %v1399_v48  ;;  %6122 = vmatpush3.bf16.msra.mxu1 %v6683_v27  ;;  %v7618_v27 = vld [vmem:[%s6779_s27 + $0x2c] sm:$0x1]  ;;  %v7790_v31 = vld [vmem:[%s6779_s27 + $0x64] sm:$0xf] }
  0xab   : > { %v3757_v32 = vshll.u32 %v7562_v4, 16  ;;  %v5235_v47 = vcombine.low %v7589_v7, %v7602_v5  ;;  %v3761_v10 = vshrl.u32 %v7562_v4, 16  ;;  %v3767_v46 = vshll.u32 %v7572_v13, 16  ;;  %6335 = vmatprep.subr.bf16.mxu1 %v7623_v1 }
  0xac   : > { %v7610_v52 = vsel %vm6953_vm6, %v1405_v11, %v1406_v6  ;;  %v3750_v60 = vrot.slane %v3748_v19, 4  ;;  %v3753_v54 = vrot.slane %v3751_v44, 5  ;;  %v3772_v9 = vshrl.u32 %v5542_v29, 16  ;;  %v1270_v11 = vld [vmem:[%s6779_s27 + $0x9c] sm:$0xe] }
  0xad   : > { %v5236_v59 = vcombine.low %v7596_v39, %v7610_v52  ;;  %v3759_v49 = vrot.slane %v3757_v32, 5  ;;  %6092 = vmatmul.mubr.msk.bf16.gmra.mrb[4].mxu1 %vm307_vm0, %v5228_v50  ;;  %v3763_v48 = vrot.slane %v3761_v10, 4  ;;  %v3769_v43 = vrot.slane %v3767_v46, 5 }
  0xae   : > { %v3775_v63 = vshll.u32 %v5542_v29, 16  ;;  %6095 = vmatprep.mubr.msk.bf16.mxu1 %vm307_vm0, %v5229_v25  ;;  %v3754_v6 = vor.u32 %v3753_v54, %v3750_v60  ;;  %v3781_v19 = vshll.u32 %v7615_v26, 16  ;;  %v3785_v44 = vshrl.u32 %v7615_v26, 16 }
  0xaf   : > { %v3791_v24 = vshll.u32 %v7618_v27, 16  ;;  %v3764_v61 = vor.u32 %v3763_v48, %v3759_v49  ;;  %v3774_v50 = vrot.slane %v3772_v9, 4  ;;  %v5221_v10 = vrot.slane %v1269_v15, 9  ;;  %v6680_v9 = vld [vmem:[%s6779_s27 + $0xb4] sm:$0xff]  }
  0xb0   : > { %v3777_v32 = vrot.slane %v3775_v63, 5  ;;  %6252 = vmatmul.mubr.msk.bf16.gmra.mrb[20].mxu0 %vm307_vm0, %v6678_v35  ;;  %v3755_v29 = vrot.slane %v3754_v6, 4  ;;  %v3783_v33 = vrot.slane %v3781_v19, 5  ;;  %v3787_v37 = vrot.slane %v3785_v44, 4  ;;  %v5545_v19 = vld [vmem:[%s6779_s27 + $0x30] sm:$0xf] }
  0xb1   : > { %v3793_v25 = vrot.slane %v3791_v24, 5  ;;  %6255 = vmatprep.mubr.msk.bf16.mxu0 %vm307_vm0, %v6679_v0  ;;  %v3765_v46 = vrot.slane %v3764_v61, 4  ;;  %v1410_v54 = vrot.slane %v7350_v2, 5  ;;  %v1413_v48 = vrot.slane %v7357_v22, 5  ;;  %v7652_v44 = vld [vmem:[%s6779_s27 + $0x34] sm:$0xf] }
  0xb2   : > { %v3778_v60 = vor.u32 %v3777_v32, %v3774_v50  ;;  %v3760_v15 = vsel %vm6818_vm3, %v3755_v29, %v3759_v49  ;;  %v3788_v35 = vor.u32 %v3787_v37, %v3783_v33  ;;  %v5222_v63 = vrot.slane %v1270_v11, 9  ;;  %v6681_v0 = vld [vmem:[%s6779_s27 + $0xc0] sm:$0xff]   ;;  %v7668_v32 = vld [vmem:[%s6779_s27 + $0x38] sm:$0x1]  ;;  %v5548_v29 = vld [vmem:[%s6779_s27 + $0x3c] sm:$0xf] }
  0xb3   : > { %v1417_v6 = vrot.slane %v7368_v23, 5  ;;  %v3770_v2 = vsel %vm6818_vm3, %v3765_v46, %v3769_v43  ;;  %v7659_v22 = vsel %vm6953_vm6, %v5221_v10, %v1410_v54  ;;  %v1412_v61 = vrot.slane %v1410_v54, 4 }
  0xb4   : > { %v3779_v24 = vrot.slane %v3778_v60, 4  ;;  %v7661_v49 = vcombine.low %v3760_v15, %v3770_v2  ;;  %v3789_v50 = vrot.slane %v3788_v35, 4  ;;  %v1420_v37 = vrot.slane %v7377_v51, 5  ;;  %v7683_v60 = vld [vmem:[%s6779_s27 + $0x40] sm:$0xf] }
  0xb5   : > { %v7665_v23 = vsel %vm6953_vm6, %v5222_v63, %v1417_v6  ;;  %v1419_v11 = vrot.slane %v1417_v6, 4  ;;  %6096 = vmatmul.mubr.msk.bf16.gmra.mrb[8].mxu1 %vm307_vm0, %v5230_v58  ;;  %v7679_v10 = vsel %vm6953_vm6, %v1412_v61, %v1413_v48  ;;  %v3796_v46 = vshrl.u32 %v5545_v19, 16 }
  0xb6   : > { %v3784_v43 = vsel %vm6818_vm3, %v3779_v24, %v3783_v33  ;;  %6099 = vmatprep.mubr.msk.bf16.mxu1 %vm307_vm0, %v5231_v40  ;;  %v3794_v56 = vsel %vm6818_vm3, %v3789_v50, %v3793_v25  ;;  %v3799_v58 = vshll.u32 %v5545_v19, 16  ;;  %v3805_v33 = vshll.u32 %v7652_v44, 16  ;;  %v1271_v24 = vld [vmem:[%s6779_s27 + $0xa8] sm:$0xe] }
  0xb7   : > { %v7694_v54 = vcombine.low %v3784_v43, %v3794_v56  ;;  %v7698_v51 = vsel %vm6953_vm6, %v1419_v11, %v1420_v37  ;;  %v3798_v48 = vrot.slane %v3796_v46, 4  ;;  %v3809_v30 = vshrl.u32 %v7652_v44, 16  ;;  %v6682_v43 = vld [vmem:[%s6779_s27 + $0xcc] sm:$0xff]  }
  0xb8   : > { %6256 = vmatmul.mubr.msk.bf16.gmra.mrb[24].mxu0 %vm307_vm0, %v6680_v9  ;;  %v3801_v25 = vrot.slane %v3799_v58, 5  ;;  %v3807_v15 = vrot.slane %v3805_v33, 5  ;;  %v3815_v35 = vshll.u32 %v7668_v32, 16  ;;  %v3820_v6 = vshrl.u32 %v5548_v29, 16  ;;  %v1272_v33 = vld [vmem:[%s6779_s27 + $0xb4] sm:$0xe] }
  0xb9   : > { %6259 = vmatprep.mubr.msk.bf16.mxu0 %vm307_vm0, %v6681_v0  ;;  %v3811_v63 = vrot.slane %v3809_v30, 4  ;;  %v3823_v19 = vshll.u32 %v5548_v29, 16  ;;  %v3829_v2 = vshll.u32 %v7683_v60, 16  ;;  %v3833_v9 = vshrl.u32 %v7683_v60, 16 }
  0xba   : > { %v3802_v61 = vor.u32 %v3801_v25, %v3798_v48  ;;  %v3817_v50 = vrot.slane %v3815_v35, 5  ;;  %v3839_v11 = vshll.u32 %v7702_v55, 16  ;;  %v3822_v46 = vrot.slane %v3820_v6, 4 }
  0xbb   : > { %v3812_v37 = vor.u32 %v3811_v63, %v3807_v15  ;;  %v3825_v56 = vrot.slane %v3823_v19, 5  ;;  %v3831_v58 = vrot.slane %v3829_v2, 5  ;;  %v3835_v30 = vrot.slane %v3833_v9, 4 }
  0xbc   : > { %v3803_v0 = vrot.slane %v3802_v61, 4  ;;  %v3841_v40 = vrot.slane %v3839_v11, 5  ;;  %v5223_v29 = vrot.slane %v1271_v24, 9  ;;  %v1424_v35 = vrot.slane %v7383_v12, 5  ;;  %v7744_v24 = vld [vmem:[%s6779_s27 + $0x50] sm:$0x1] }
  0xbd   : > { %6100 = vmatmul.mubr.msk.bf16.gmra.mrb[12].mxu1 %vm307_vm0, %v5232_v53  ;;  %v3813_v48 = vrot.slane %v3812_v37, 4  ;;  %v3826_v25 = vor.u32 %v3825_v56, %v3822_v46  ;;  %v1427_v63 = vrot.slane %v7396_v38, 5  ;;  %v3836_v19 = vor.u32 %v3835_v30, %v3831_v58  ;;  %v7757_v37 = vld [vmem:[%s6779_s27 + $0x58] sm:$0xf] }
  0xbe   : > { %6103 = vmatprep.mubr.msk.bf16.mxu1 %vm307_vm0, %v5233_v3  ;;  %v3808_v6 = vsel %vm6818_vm3, %v3803_v0, %v3807_v15  ;;  %v5224_v2 = vrot.slane %v1272_v33, 9  ;;  %v1431_v8 = vrot.slane %v7409_v62, 5  ;;  %v7733_v38 = vsel %vm6953_vm6, %v5223_v29, %v1424_v35  ;;  %v7765_v33 = vld [vmem:[%s6779_s27 + $0x5c] sm:$0x1] }
  0xbf   : > { %v3818_v41 = vsel %vm6818_vm3, %v3813_v48, %v3817_v50  ;;  %v3827_v12 = vrot.slane %v3826_v25, 4  ;;  %v1426_v53 = vrot.slane %v1424_v35, 4  ;;  %v3837_v3 = vrot.slane %v3836_v19, 4 }
  0xc0   : > { %6260 = vmatmul.mubr.msk.bf16.gmra.mrb[28].mxu0 %vm307_vm0, %v6682_v43  ;;  %v5589_v14 = vcombine.low %v3808_v6, %v3818_v41  ;;  %v7741_v62 = vsel %vm6953_vm6, %v5224_v2, %v1431_v8  ;;  %v1433_v15 = vrot.slane %v1431_v8, 4  ;;  %v1434_v9 = vrot.slane %v7415_v28, 5  ;;  %v5554_v43 = vld [vmem:[%s6779_s27 + $0x54] sm:$0xf]  ;;  %v5557_v2 = vld [vmem:[%s6779_s27 + $0x60] sm:$0xf] }
  0xc1   : > { %6267 = vmatprep.mubr.msk.bf16.mxu0 %vm307_vm0, %v7661_v49  ;;  %v3832_v61 = vsel %vm6818_vm3, %v3827_v12, %v3831_v58  ;;  %v7752_v50 = vsel %vm6953_vm6, %v1426_v53, %v1427_v63  ;;  %v3844_v11 = vshrl.u32 %v5551_v42, 16  ;;  %v3842_v46 = vsel %vm6818_vm3, %v3837_v3, %v3841_v40 }
  0xc2   : > { %v5239_v56 = vcombine.low %v7733_v38, %v7752_v50  ;;  %v3847_v49 = vshll.u32 %v5551_v42, 16  ;;  %v3853_v58 = vshll.u32 %v7736_v20, 16  ;;  %v7767_v0 = vcombine.low %v3832_v61, %v3842_v46 }
  0xc3   : > { %v7771_v28 = vsel %vm6953_vm6, %v1433_v15, %v1434_v9  ;;  %v3846_v30 = vrot.slane %v3844_v11, 4  ;;  %v3857_v29 = vshrl.u32 %v7736_v20, 16  ;;  %v3863_v25 = vshll.u32 %v7744_v24, 16  ;;  %v7798_v9 = vld [vmem:[%s6779_s27 + $0x68] sm:$0x1] }
  0xc4   : > { %v5240_v40 = vcombine.low %v7741_v62, %v7771_v28  ;;  %v3849_v48 = vrot.slane %v3847_v49, 5  ;;  %v3855_v42 = vrot.slane %v3853_v58, 5  ;;  %v3868_v63 = vshrl.u32 %v5554_v43, 16 }
  0xc5   : > { %6104 = vmatmul.mubr.msk.bf16.gmra.mrb[16].mxu1 %vm307_vm0, %v5234_v17  ;;  %v3859_v35 = vrot.slane %v3857_v29, 4  ;;  %v3871_v6 = vshll.u32 %v5554_v43, 16  ;;  %v3877_v19 = vshll.u32 %v7757_v37, 16  ;;  %v3865_v41 = vrot.slane %v3863_v25, 5  ;;  %v6689_v17 = vld [vmem:[%s8407_s1 + $0x88] sm:$0xff]  }
  0xc6   : > { %6107 = vmatprep.mubr.msk.bf16.mxu1 %vm307_vm0, %v5235_v47  ;;  %v3850_v8 = vor.u32 %v3849_v48, %v3846_v30  ;;  %v3881_v12 = vshrl.u32 %v7757_v37, 16  ;;  %v3887_v16 = vshll.u32 %v7765_v33, 16  ;;  %v3870_v3 = vrot.slane %v3868_v63, 4  ;;  %v5560_v30 = vld [vmem:[%s6779_s27 + $0x6c] sm:$0xf] }
  0xc7   : > { %v3860_v53 = vor.u32 %v3859_v35, %v3855_v42  ;;  %v3873_v15 = vrot.slane %v3871_v6, 5  ;;  %v3879_v7 = vrot.slane %v3877_v19, 5  ;;  %v3892_v11 = vshrl.u32 %v5557_v2, 16  ;;  %v7808_v35 = vld [vmem:[%s6779_s27 + $0x70] sm:$0xf] }
  0xc8   : > { %6268 = vmatmul.mubr.msk.bf16.vlgmr.msra.gmra.mrb[0].mxu0 %vm307_vm0, %v7694_v54  ;;  %v3851_v5 = vrot.slane %v3850_v8, 4  ;;  %v3883_v47 = vrot.slane %v3881_v12, 4  ;;  %v3889_v61 = vrot.slane %v3887_v16, 5  ;;  %v3895_v49 = vshll.u32 %v5557_v2, 16  ;;  %v7813_v19 = vld [vmem:[%s6779_s27 + $0x74] sm:$0x1] }
  0xc9   : > { %6300 = vmatpush3.bf16.msra.mxu0 %v7401_v45  ;;  %6271 = vmatprep.mubr.msk.bf16.mxu0 %vm307_vm0, %v5589_v14  ;;  %v3861_v43 = vrot.slane %v3860_v53, 4  ;;  %v3874_v46 = vor.u32 %v3873_v15, %v3870_v3  ;;  %v3901_v58 = vshll.u32 %v7790_v31, 16  ;;  %v3894_v48 = vrot.slane %v3892_v11, 4  ;;  %v5563_v15 = vld [vmem:[%s6779_s27 + $0x78] sm:$0xf] }
  0xca   : > { %v3856_v54 = vsel %vm6818_vm3, %v3851_v5, %v3855_v42  ;;  %v3884_v29 = vor.u32 %v3883_v47, %v3879_v7  ;;  %v3905_v25 = vshrl.u32 %v7790_v31, 16  ;;  %6301 = vmatprep.subr.bf16.mxu0 %v6689_v17  ;;  %v3897_v63 = vrot.slane %v3895_v49, 5  ;;  %v7831_v11 = vld [vmem:[%s6779_s27 + $0x7c] sm:$0xf] }
  0xcb   : > { %v3866_v45 = vsel %vm6818_vm3, %v3861_v43, %v3865_v41  ;;  %v3875_v14 = vrot.slane %v3874_v46, 4  ;;  %v3903_v6 = vrot.slane %v3901_v58, 5  ;;  %v3911_v12 = vshll.u32 %v7798_v9, 16 }
  0xcc   : > { %v5591_v2 = vcombine.low %v3856_v54, %v3866_v45  ;;  %v3885_v8 = vrot.slane %v3884_v29, 4  ;;  %v3907_v42 = vrot.slane %v3905_v25, 4  ;;  %v3898_v41 = vor.u32 %v3897_v63, %v3894_v48  ;;  %v5566_v25 = vld [vmem:[%s6779_s27 + $0x84] sm:$0xf] }
  0xcd   : > { %6108 = vmatmul.mubr.msk.bf16.gmra.mrb[20].mxu1 %vm307_vm0, %v5236_v59  ;;  %v3880_v16 = vsel %vm6818_vm3, %v3875_v14, %v3879_v7  ;;  %v3916_v53 = vshrl.u32 %v5560_v30, 16  ;;  %v3919_v3 = vshll.u32 %v5560_v30, 16  ;;  %6302 = vmatpush3.bf16.msra.mxu0 %v6689_v17  ;;  %v8414_v5 = vcombine.low %v7659_v22, %v7679_v10  ;;  %v7834_v17 = vld [vmem:[%s6779_s27 + $0x80] sm:$0x1] }
  0xce   : > { %v3890_v47 = vsel %vm6818_vm3, %v3885_v8, %v3889_v61  ;;  %v3908_v39 = vor.u32 %v3907_v42, %v3903_v6  ;;  %v3913_v52 = vrot.slane %v3911_v12, 5  ;;  %v3925_v59 = vshll.u32 %v7808_v35, 16  ;;  %v7848_v8 = vld [vmem:[%s6779_s27 + $0x88] sm:$0xf] }
  0xcf   : > { %6111 = vmatprep.mubr.msk.bf16.mxu1 %vm307_vm0, %v8414_v5  ;;  %v5592_v7 = vcombine.low %v3880_v16, %v3890_v47  ;;  %v3899_v43 = vrot.slane %v3898_v41, 4  ;;  %v3918_v46 = vrot.slane %v3916_v53, 4  ;;  %v3921_v49 = vrot.slane %v3919_v3, 5  ;;  %v7851_v41 = vld [vmem:[%s6779_s27 + $0x8c] sm:$0x1] }
  0xd0   : > { %6272 = vmatmul.mubr.msk.bf16.gmra.mrb[4].mxu0 %vm307_vm0, %v7767_v0  ;;  %v3909_v22 = vrot.slane %v3908_v39, 4  ;;  %v3927_v10 = vrot.slane %v3925_v59, 5  ;;  %v3929_v61 = vshrl.u32 %v7808_v35, 16  ;;  %v3935_v58 = vshll.u32 %v7813_v19, 16 }
  0xd1   : > { %6275 = vmatprep.mubr.msk.bf16.mxu0 %vm307_vm0, %v5591_v2  ;;  %v3904_v30 = vsel %vm6818_vm3, %v3899_v43, %v3903_v6  ;;  %v3922_v54 = vor.u32 %v3921_v49, %v3918_v46  ;;  %v3940_v29 = vshrl.u32 %v5563_v15, 16  ;;  %v3943_v48 = vshll.u32 %v5563_v15, 16 }
  0xd2   : > { %v3914_v45 = vsel %vm6818_vm3, %v3909_v22, %v3913_v52  ;;  %v3931_v0 = vrot.slane %v3929_v61, 4  ;;  %v3937_v14 = vrot.slane %v3935_v58, 5  ;;  %v3949_v63 = vshll.u32 %v7831_v11, 16  ;;  %v5569_v58 = vld [vmem:[%s6779_s27 + $0x90] sm:$0xf] }
  0xd3   : > { %v5593_v42 = vcombine.low %v3904_v30, %v3914_v45  ;;  %v3923_v12 = vrot.slane %v3922_v54, 4  ;;  %v3942_v16 = vrot.slane %v3940_v29, 4  ;;  %v3945_v2 = vrot.slane %v3943_v48, 5  ;;  %v7873_v54 = vld [vmem:[%s6779_s27 + $0x94] sm:$0xf] }
  0xd4   : > { %v3932_v6 = vor.u32 %v3931_v0, %v3927_v10  ;;  %v3951_v53 = vrot.slane %v3949_v63, 5  ;;  %v3953_v3 = vshrl.u32 %v7831_v11, 16  ;;  %v3959_v15 = vshll.u32 %v7834_v17, 16  ;;  %v6685_v0 = vld [vmem:[%s6779_s27 + $0xc] sm:$0xff]  }
  0xd5   : > { %v8415_v5 = vcombine.low %v7665_v23, %v7698_v51  ;;  %v3928_v47 = vsel %vm6818_vm3, %v3923_v12, %v3927_v10  ;;  %v3946_v39 = vor.u32 %v3945_v2, %v3942_v16  ;;  %v3964_v52 = vshrl.u32 %v5566_v25, 16 }
  0xd6   : > { %v3967_v59 = vshll.u32 %v5566_v25, 16  ;;  %v3933_v43 = vrot.slane %v3932_v6, 4  ;;  %v3955_v46 = vrot.slane %v3953_v3, 4  ;;  %v3961_v49 = vrot.slane %v3959_v15, 5  ;;  %v5572_v15 = vld [vmem:[%s6779_s27 + $0x9c] sm:$0xf] }
  0xd7   : > { %6112 = vmatmul.mubr.msk.bf16.gmra.mrb[24].mxu1 %vm307_vm0, %v8415_v5  ;;  %v3973_v22 = vshll.u32 %v7848_v8, 16  ;;  %v3947_v23 = vrot.slane %v3946_v39, 4  ;;  %v3966_v51 = vrot.slane %v3964_v52, 4  ;;  %v3977_v10 = vshrl.u32 %v7848_v8, 16  ;;  %v7889_v52 = vld [vmem:[%s6779_s27 + $0xa0] sm:$0xf] }
  0xd8   : > { %6115 = vmatprep.mubr.msk.bf16.mxu1 %vm307_vm0, %v5239_v56  ;;  %v3969_v61 = vrot.slane %v3967_v59, 5  ;;  %6276 = vmatmul.mubr.msk.bf16.gmra.mrb[8].mxu0 %vm307_vm0, %v5592_v7  ;;  %v3938_v38 = vsel %vm6818_vm3, %v3933_v43, %v3937_v14  ;;  %v3956_v50 = vor.u32 %v3955_v46, %v3951_v53  ;;  %v3983_v30 = vshll.u32 %v7851_v41, 16  ;;  %v7879_v7 = vld [vmem:[%s6779_s27 + $0x98] sm:$0x1] }
  0xd9   : > { %v3975_v56 = vrot.slane %v3973_v22, 5  ;;  %6279 = vmatprep.mubr.msk.bf16.mxu0 %vm307_vm0, %v5593_v42  ;;  %v5594_v29 = vcombine.low %v3928_v47, %v3938_v38  ;;  %v3952_v48 = vsel %vm6818_vm3, %v3947_v23, %v3951_v53  ;;  %v3979_v45 = vrot.slane %v3977_v10, 4  ;;  %v5575_v38 = vld [vmem:[%s6779_s27 + $0xa8] sm:$0xf] }
  0xda   : > { %v3970_v25 = vor.u32 %v3969_v61, %v3966_v51  ;;  %v3957_v14 = vrot.slane %v3956_v50, 4  ;;  %v3985_v63 = vrot.slane %v3983_v30, 5  ;;  %v3988_v12 = vshrl.u32 %v5569_v58, 16  ;;  %v7899_v61 = vld [vmem:[%s6779_s27 + $0xa4] sm:$0x1] }
  0xdb   : > { %v3991_v16 = vshll.u32 %v5569_v58, 16  ;;  %v3980_v6 = vor.u32 %v3979_v45, %v3975_v56  ;;  %v3997_v3 = vshll.u32 %v7873_v54, 16  ;;  %v4001_v42 = vshrl.u32 %v7873_v54, 16  ;;  %v6686_v45 = vld [vmem:[%s6779_s27 + $0x18] sm:$0xff]  }
  0xdc   : > { %v3971_v2 = vrot.slane %v3970_v25, 4  ;;  %v3962_v53 = vsel %vm6818_vm3, %v3957_v14, %v3961_v49  ;;  %v3990_v5 = vrot.slane %v3988_v12, 4  ;;  %v4007_v39 = vshll.u32 %v7879_v7, 16  ;;  %v7908_v25 = vld [vmem:[%s6779_s27 + $0xac] sm:$0xf] }
  0xdd   : > { %v3993_v47 = vrot.slane %v3991_v16, 5  ;;  %v5595_v59 = vcombine.low %v3952_v48, %v3962_v53  ;;  %v3981_v46 = vrot.slane %v3980_v6, 4  ;;  %v3999_v22 = vrot.slane %v3997_v3, 5  ;;  %v6687_v16 = vld [vmem:[%s6779_s27 + $0x24] sm:$0xff]  }
  0xde   : > { %v3976_v43 = vsel %vm6818_vm3, %v3971_v2, %v3975_v56  ;;  %v4003_v23 = vrot.slane %v4001_v42, 4  ;;  %v4009_v51 = vrot.slane %v4007_v39, 5  ;;  %v4012_v10 = vshrl.u32 %v5572_v15, 16  ;;  %v5578_v39 = vld [vmem:[%s6779_s27 + $0xb4] sm:$0xf] }
  0xdf   : > { %6116 = vmatmul.mubr.msk.bf16.gmra.mrb[28].mxu1 %vm307_vm0, %v5240_v40  ;;  %v3994_v49 = vor.u32 %v3993_v47, %v3990_v5  ;;  %v3986_v62 = vsel %vm6818_vm3, %v3981_v46, %v3985_v63  ;;  %v4015_v28 = vshll.u32 %v5572_v15, 16  ;;  %v4021_v40 = vshll.u32 %v7889_v52, 16  ;;  %v7917_v5 = vld [vmem:[%s6779_s27 + $0xb0] sm:$0x1] }
  0xe0   : > { %6123 = vmatprep.mubr.msk.bf16.mxu1 %vm307_vm0, %v6685_v0  ;;  %v4025_v58 = vshrl.u32 %v7889_v52, 16  ;;  %6280 = vmatmul.mubr.msk.bf16.gmra.mrb[12].mxu0 %vm307_vm0, %v5594_v29  ;;  %v5596_v50 = vcombine.low %v3976_v43, %v3986_v62  ;;  %v4004_v30 = vor.u32 %v4003_v23, %v3999_v22  ;;  %v4014_v48 = vrot.slane %v4012_v10, 4 }
  0xe1   : > { %v3995_v56 = vrot.slane %v3994_v49, 4  ;;  %6283 = vmatprep.mubr.msk.bf16.mxu0 %vm307_vm0, %v5595_v59  ;;  %v4017_v0 = vrot.slane %v4015_v28, 5  ;;  %v4023_v14 = vrot.slane %v4021_v40, 5  ;;  %v4031_v12 = vshll.u32 %v7899_v61, 16 }
  0xe2   : > { %v4027_v63 = vrot.slane %v4025_v58, 4  ;;  %v4005_v2 = vrot.slane %v4004_v30, 4  ;;  %v4036_v6 = vshrl.u32 %v5575_v38, 16  ;;  %v4039_v3 = vshll.u32 %v5575_v38, 16 }
  0xe3   : > { %v4000_v29 = vsel %vm6818_vm3, %v3995_v56, %v3999_v22  ;;  %v4018_v42 = vor.u32 %v4017_v0, %v4014_v48  ;;  %v4033_v53 = vrot.slane %v4031_v12, 5  ;;  %v4045_v47 = vshll.u32 %v7908_v25, 16  ;;  %v7925_v22 = vld [vmem:[%s6779_s27 + $0xb8] sm:$0xf]  ;;  %v7936_v48 = vld [vmem:[%s6779_s27 + $0xbc] sm:$0x1] }
  0xe4   : > { %v4028_v15 = vor.u32 %v4027_v63, %v4023_v14  ;;  %v4010_v59 = vsel %vm6818_vm3, %v4005_v2, %v4009_v51  ;;  %v4038_v43 = vrot.slane %v4036_v6, 4  ;;  %v4041_v46 = vrot.slane %v4039_v3, 5  ;;  %v6707_v63 = vld [vmem:[%s8407_s1 + $0x48] sm:$0xff]   ;;  %v7945_v2 = vld [vmem:[%s6779_s27 + $0xc4] sm:$0xf]  ;;  %v6688_v6 = vld [vmem:[%s6779_s27 + $0x30] sm:$0xff]  }
  0xe5   : > { %v4049_v49 = vshrl.u32 %v7908_v25, 16  ;;  %v5597_v23 = vcombine.low %v4000_v29, %v4010_v59  ;;  %v4019_v10 = vrot.slane %v4018_v42, 4  ;;  %v4047_v28 = vrot.slane %v4045_v47, 5  ;;  %v6690_v47 = vld [vmem:[%s6779_s27 + $0x3c] sm:$0xff]  }
  0xe6   : > { %v4029_v62 = vrot.slane %v4028_v15, 4  ;;  %v4042_v40 = vor.u32 %v4041_v46, %v4038_v43  ;;  %v4055_v58 = vshll.u32 %v7917_v5, 16  ;;  %v4060_v38 = vshrl.u32 %v5578_v39, 16  ;;  %v7955_v43 = vld [vmem:[%s6779_s27 + $0xc8] sm:$0x1] }
  0xe7   : > { %6124 = vmatmul.mubr.msk.bf16.vlgmr.msra.gmra.mrb[0].mxu1 %vm307_vm0, %v6686_v45  ;;  %v4051_v51 = vrot.slane %v4049_v49, 4  ;;  %v4024_v56 = vsel %vm6818_vm3, %v4019_v10, %v4023_v14  ;;  %v4063_v45 = vshll.u32 %v5578_v39, 16  ;;  %v4069_v0 = vshll.u32 %v7925_v22, 16 }
  0xe8   : > { %6127 = vmatprep.mubr.msk.bf16.mxu1 %vm307_vm0, %v6687_v16  ;;  %6337 = vmatpush3.bf16.msra.mxu1 %v7623_v1  ;;  %v4034_v30 = vsel %vm6818_vm3, %v4029_v62, %v4033_v53  ;;  %v5581_v1 = vld [vmem:[%s6779_s27 + $0xc0] sm:$0xf]  ;;  %v4043_v14 = vrot.slane %v4042_v40, 4  ;;  %v4057_v29 = vrot.slane %v4055_v58, 5  ;;  %v4062_v3 = vrot.slane %v4060_v38, 4 }
  0xe9   : > { %6336 = vmatprep.subr.bf16.mxu1 %v6707_v63  ;;  %6284 = vmatmul.mubr.msk.bf16.gmra.mrb[16].mxu0 %vm307_vm0, %v5596_v50  ;;  %v5598_v12 = vcombine.low %v4024_v56, %v4034_v30  ;;  %v4052_v16 = vor.u32 %v4051_v51, %v4047_v28  ;;  %v4065_v42 = vrot.slane %v4063_v45, 5  ;;  %v4071_v15 = vrot.slane %v4069_v0, 5  ;;  %v5584_v40 = vld [vmem:[%s6779_s27 + $0xcc] sm:$0xf] }
  0xea   : > { %6287 = vmatprep.mubr.msk.bf16.mxu0 %vm307_vm0, %v5597_v23  ;;  %v4073_v53 = vshrl.u32 %v7925_v22, 16  ;;  %v4048_v50 = vsel %vm6818_vm3, %v4043_v14, %v4047_v28  ;;  %v4079_v59 = vshll.u32 %v7936_v48, 16  ;;  %v4084_v46 = vshrl.u32 %v5581_v1, 16 }
  0xeb   : > { %v4053_v39 = vrot.slane %v4052_v16, 4  ;;  %v4066_v49 = vor.u32 %v4065_v42, %v4062_v3  ;;  %v4087_v10 = vshll.u32 %v5581_v1, 16  ;;  %v4093_v62 = vshll.u32 %v7945_v2, 16 }
  0xec   : > { %6338 = vmatpush3.bf16.msra.mxu1 %v6707_v63  ;;  %v4075_v23 = vrot.slane %v4073_v53, 4  ;;  %v4081_v58 = vrot.slane %v4079_v59, 5  ;;  %v4086_v38 = vrot.slane %v4084_v46, 4  ;;  %v4097_v28 = vshrl.u32 %v7945_v2, 16  ;;  %v7964_v63 = vld [vmem:[%s6779_s27 + $0xd0] sm:$0xf] }
  0xed   : > { %v4058_v51 = vsel %vm6818_vm3, %v4053_v39, %v4057_v29  ;;  %v4067_v30 = vrot.slane %v4066_v49, 4  ;;  %v4089_v0 = vrot.slane %v4087_v10, 5  ;;  %v4095_v1 = vrot.slane %v4093_v62, 5  ;;  %v7971_v53 = vld [vmem:[%s6779_s27 + $0xd4] sm:$0x1] }
  0xee   : > { %v5599_v56 = vcombine.low %v4048_v50, %v4058_v51  ;;  %v4076_v45 = vor.u32 %v4075_v23, %v4071_v15  ;;  %v4099_v14 = vrot.slane %v4097_v28, 4  ;;  %v4103_v16 = vshll.u32 %v7955_v43, 16  ;;  %v5621_v49 = vld [vmem:[%s6779_s27 + $0x18] sm:$0xe]  ;;  %v6691_v23 = vld [vmem:[%s6779_s27 + $0x48] sm:$0xff]  }
  0xef   : > { %6128 = vmatmul.mubr.msk.bf16.gmra.mrb[4].mxu1 %vm307_vm0, %v6688_v6  ;;  %v4108_v29 = vshrl.u32 %v5584_v40, 16  ;;  %v4072_v3 = vsel %vm6818_vm3, %v4067_v30, %v4071_v15  ;;  %v4090_v6 = vor.u32 %v4089_v0, %v4086_v38  ;;  %v4111_v50 = vshll.u32 %v5584_v40, 16  ;;  %v6692_v51 = vld [vmem:[%s6779_s27 + $0x54] sm:$0xff]  }
  0xf0   : > { %6131 = vmatprep.mubr.msk.bf16.mxu1 %vm307_vm0, %v6690_v47  ;;  %v4077_v42 = vrot.slane %v4076_v45, 4  ;;  %v4100_v39 = vor.u32 %v4099_v14, %v4095_v1  ;;  %v4105_v59 = vrot.slane %v4103_v16, 5  ;;  %v4117_v46 = vshll.u32 %v7964_v63, 16 }
  0xf1   : > { %6288 = vmatmul.mubr.msk.bf16.gmra.mrb[20].mxu0 %vm307_vm0, %v5598_v12  ;;  %v4110_v47 = vrot.slane %v4108_v29, 4  ;;  %v4091_v10 = vrot.slane %v4090_v6, 4  ;;  %v4113_v62 = vrot.slane %v4111_v50, 5  ;;  %v4121_v40 = vshrl.u32 %v7964_v63, 16  ;;  %v5623_v6 = vld [vmem:[%s6779_s27 + $0x30] sm:$0xe] }
  0xf2   : > { %6291 = vmatprep.mubr.msk.bf16.mxu0 %vm307_vm0, %v5599_v56  ;;  %v4082_v15 = vsel %vm6818_vm3, %v4077_v42, %v4081_v58  ;;  %v2392_v12 = vor.u32 %v7198_v57, %v7176_v34  ;;  %v4101_v38 = vrot.slane %v4100_v39, 4  ;;  %v4119_v28 = vrot.slane %v4117_v46, 5  ;;  %v5622_v58 = vld [vmem:[%s6779_s27 + $0x24] sm:$0xe] }
  0xf3   : > { %v4127_v30 = vshll.u32 %v7971_v53, 16  ;;  %v4096_v45 = vsel %vm6818_vm3, %v4091_v10, %v4095_v1  ;;  %v4114_v56 = vor.u32 %v4113_v62, %v4110_v47  ;;  %v4123_v0 = vrot.slane %v4121_v40, 4 }
  0xf4   : > { %v5637_v14 = vrot.slane %v5621_v49, 9  ;;  %v5600_v16 = vcombine.low %v4072_v3, %v4082_v15  ;;  %v4106_v29 = vsel %vm6818_vm3, %v4101_v38, %v4105_v59  ;;  %v4502_v42 = vrot.slane %v7562_v4, 5 }
  0xf5   : > { %v4505_v57 = vrot.slane %v7572_v13, 5  ;;  %v5601_v50 = vcombine.low %v4096_v45, %v4106_v29  ;;  %v4115_v39 = vrot.slane %v4114_v56, 4  ;;  %v4124_v46 = vor.u32 %v4123_v0, %v4119_v28  ;;  %v5624_v45 = vld [vmem:[%s6779_s27 + $0x3c] sm:$0xe]  ;;  %v6694_v0 = vld [vmem:[%s6779_s27 + $0x6c] sm:$0xff]  }
  0xf6   : > { %v4129_v1 = vrot.slane %v4127_v30, 5  ;;  %v4503_v3 = vsel %vm6953_vm6, %v5637_v14, %v4502_v42  ;;  %v4504_v47 = vrot.slane %v4502_v42, 4  ;;  %v5638_v59 = vrot.slane %v5622_v58, 9  ;;  %v6693_v30 = vld [vmem:[%s6779_s27 + $0x60] sm:$0xff]   ;;  %v5626_v58 = vld [vmem:[%s6779_s27 + $0x54] sm:$0xe] }
  0xf7   : > { %6132 = vmatmul.mubr.msk.bf16.gmra.mrb[8].mxu1 %vm307_vm0, %v6691_v23  ;;  %v4509_v4 = vrot.slane %v7615_v26, 5  ;;  %v4125_v13 = vrot.slane %v4124_v46, 4  ;;  %v4512_v49 = vrot.slane %v7618_v27, 5  ;;  %v5639_v23 = vrot.slane %v5623_v6, 9 }
  0xf8   : > { %6135 = vmatprep.mubr.msk.bf16.mxu1 %vm307_vm0, %v6692_v51  ;;  %v4516_v15 = vrot.slane %v7652_v44, 5  ;;  %v4120_v10 = vsel %vm6818_vm3, %v4115_v39, %v4119_v28  ;;  %v4506_v62 = vsel %vm6953_vm6, %v4504_v47, %v4505_v57  ;;  %v4519_v26 = vrot.slane %v7668_v32, 5  ;;  %v5625_v51 = vld [vmem:[%s6779_s27 + $0x48] sm:$0xe]  ;;  %v5349_v57 = vld [vmem:[%s6779_s27 + $0x6c] sm:$0xf] }
  0xf9   : > { %6292 = vmatmul.mubr.msk.bf16.gmra.mrb[24].mxu0 %vm307_vm0, %v5600_v16  ;;  %v4511_v40 = vrot.slane %v4509_v4, 4  ;;  %v8416_v38 = vshll.u32 %v7161_v18, 16  ;;  %v4130_v44 = vsel %vm6818_vm3, %v4125_v13, %v4129_v1  ;;  %v8016_v56 = vrot.slane %v2392_v12, 4 }
  0xfa   : > { %6295 = vmatprep.mubr.msk.bf16.mxu0 %vm307_vm0, %v5601_v50  ;;  %v4518_v28 = vrot.slane %v4516_v15, 4  ;;  %v5653_v14 = vcombine.low %v4503_v3, %v4506_v62  ;;  %v8021_v32 = vsel %vm6953_vm6, %v5638_v59, %v4509_v4  ;;  %v4523_v18 = vrot.slane %v7683_v60, 5 }
  0xfb   : > { %v8009_v27 = vrot.slane %v8416_v38, 5  ;;  %v5602_v16 = vcombine.low %v4120_v10, %v4130_v44  ;;  %v8027_v29 = vsel %vm6953_vm6, %v4511_v40, %v4512_v49  ;;  %v8031_v42 = vsel %vm6953_vm6, %v5639_v23, %v4516_v15  ;;  %v5352_v49 = vld [vmem:[%s6779_s27 + $0x78] sm:$0xf]  ;;  %v6708_v10 = vld [vmem:[%s6779_s27 + $0x70] sm:$0xf] }
  0xfc   : > { %v5641_v12 = vrot.slane %v5625_v51, 9  ;;  %v8036_v6 = vsel %vm6953_vm6, %v4518_v28, %v4519_v26  ;;  %v5640_v50 = vrot.slane %v5624_v45, 9  ;;  %v4526_v39 = vrot.slane %v7702_v55, 5  ;;  %v6695_v26 = vld [vmem:[%s6779_s27 + $0x78] sm:$0xff]   ;;  %v5627_v28 = vld [vmem:[%s6779_s27 + $0x60] sm:$0xe] }
  0xfd   : > { %v4530_v60 = vrot.slane %v7736_v20, 5  ;;  %v4533_v46 = vrot.slane %v7744_v24, 5  ;;  %v5642_v1 = vrot.slane %v5626_v58, 9  ;;  %v4537_v3 = vrot.slane %v7757_v37, 5  ;;  %v6696_v45 = vld [vmem:[%s6779_s27 + $0x84] sm:$0xff]  }
  0xfe   : > { %v4540_v47 = vrot.slane %v7765_v33, 5  ;;  %v4525_v59 = vrot.slane %v4523_v18, 4  ;;  %v2352_v20 = vshrl.u32 %v5349_v57, 16  ;;  %v5654_v13 = vcombine.low %v8021_v32, %v8027_v29 }
  0xff   : > { %6136 = vmatmul.mubr.msk.bf16.gmra.mrb[12].mxu1 %vm307_vm0, %v6693_v30  ;;  %v8047_v55 = vsel %vm6953_vm6, %v5641_v12, %v4530_v60  ;;  %v4532_v4 = vrot.slane %v4530_v60, 4  ;;  %v8053_v24 = vsel %vm6953_vm6, %v5642_v1, %v4537_v3  ;;  %v4539_v37 = vrot.slane %v4537_v3, 4 }
 0x100   : > { %6139 = vmatprep.mubr.msk.bf16.mxu1 %vm307_vm0, %v6694_v0  ;;  %v2355_v33 = vshll.u32 %v5349_v57, 16  ;;  %v5655_v23 = vcombine.low %v8031_v42, %v8036_v6  ;;  %v2361_v62 = vshll.u32 %v6708_v10, 16  ;;  %v2365_v40 = vshrl.u32 %v6708_v10, 16 }
 0x101   : > { %6296 = vmatmul.mubr.msk.bf16.gmra.mrb[28].mxu0 %vm307_vm0, %v5602_v16  ;;  %v8061_v15 = vsel %vm6953_vm6, %v4532_v4, %v4533_v46  ;;  %v8070_v38 = vsel %vm6953_vm6, %v4539_v37, %v4540_v47  ;;  %v2354_v30 = vrot.slane %v2352_v20, 4  ;;  %v8076_v0 = vsel %vm6953_vm6, %v5640_v50, %v4523_v18  ;;  %v5628_v16 = vld [vmem:[%s6779_s27 + $0x6c] sm:$0xe]  ;;  %v6709_v18 = vld [vmem:[%s6779_s27 + $0x74] sm:$0x1] }
 0x102   : > { %6303 = vmatprep.mubr.msk.bf16.mxu0 %vm307_vm0, %v5653_v14  ;;  %v5657_v51 = vcombine.low %v8047_v55, %v8061_v15  ;;  %v2357_v44 = vrot.slane %v2355_v33, 5  ;;  %v8080_v14 = vsel %vm6953_vm6, %v4525_v59, %v4526_v39  ;;  %v5658_v32 = vcombine.low %v8053_v24, %v8070_v38  ;;  %v5355_v46 = vld [vmem:[%s6779_s27 + $0x84] sm:$0xf] }
 0x103   : > { %v2376_v58 = vshrl.u32 %v5352_v49, 16  ;;  %v8085_v29 = vrot.slane %v2361_v62, 5  ;;  %v2367_v42 = vrot.slane %v2365_v40, 4  ;;  %v2379_v12 = vshll.u32 %v5352_v49, 16  ;;  %v5358_v40 = vld [vmem:[%s6779_s27 + $0x90] sm:$0xf] }
 0x104   : > { %v2398_v57 = vsel %vm6818_vm3, %v8016_v56, %v8009_v27  ;;  %v2371_v6 = vshll.u32 %v6709_v18, 16  ;;  %v5643_v60 = vrot.slane %v5627_v28, 9  ;;  %v4544_v39 = vrot.slane %v7790_v31, 5  ;;  %v6698_v28 = vld [vmem:[%s6779_s27 + $0x9c] sm:$0xff]  }
 0x105   : > { %v2378_v50 = vrot.slane %v2376_v58, 4  ;;  %v2358_v1 = vor.u32 %v2357_v44, %v2354_v30  ;;  %v2381_v3 = vrot.slane %v2379_v12, 5  ;;  %v4547_v47 = vrot.slane %v7798_v9, 5 }
 0x106   : > { %v5644_v59 = vrot.slane %v5628_v16, 9  ;;  %v5656_v27 = vcombine.low %v8076_v0, %v8080_v14  ;;  %v8101_v56 = vsel %vm6953_vm6, %v5643_v60, %v4544_v39  ;;  %v4546_v31 = vrot.slane %v4544_v39, 4  ;;  %v6710_v14 = vld [vmem:[%s6779_s27 + $0x88] sm:$0xf] }
 0x107   : > { %6140 = vmatmul.mubr.msk.bf16.gmra.mrb[16].mxu1 %vm307_vm0, %v6695_v26  ;;  %v4551_v4 = vrot.slane %v7808_v35, 5  ;;  %v2368_v20 = vor.u32 %v2367_v42, %v8085_v29  ;;  %v2382_v37 = vor.u32 %v2381_v3, %v2378_v50  ;;  %v4554_v9 = vrot.slane %v7813_v19, 5  ;;  %v6697_v26 = vld [vmem:[%s6779_s27 + $0x90] sm:$0xff]  }
 0x108   : > { %6143 = vmatprep.mubr.msk.bf16.mxu1 %vm307_vm0, %v6696_v45  ;;  %v2400_v33 = vshrl.u32 %v5355_v46, 16  ;;  %v8107_v49 = vrot.slane %v2371_v6, 5  ;;  %v8111_v10 = vsel %vm6953_vm6, %v4546_v31, %v4547_v47  ;;  %v8120_v19 = vrot.slane %v2358_v1, 4  ;;  %v6711_v1 = vld [vmem:[%s6779_s27 + $0x8c] sm:$0x1] }
 0x109   : > { %6304 = vmatmul.mubr.msk.bf16.vlgmr.msra.gmra.mrb[0].mxu0 %vm307_vm0, %v5654_v13  ;;  %v8115_v62 = vsel %vm6953_vm6, %v5644_v59, %v4551_v4  ;;  %v4553_v35 = vrot.slane %v4551_v4, 4  ;;  %v2383_v30 = vrot.slane %v2382_v37, 4  ;;  %v5659_v13 = vcombine.low %v8101_v56, %v8111_v10  ;;  %v6712_v31 = vld [vmem:[%s6779_s27 + $0x94] sm:$0xf] }
 0x10a   : > { %6307 = vmatprep.mubr.msk.bf16.mxu0 %vm307_vm0, %v5655_v23  ;;  %v2402_v44 = vrot.slane %v2400_v33, 4  ;;  %v2403_v0 = vshll.u32 %v5355_v46, 16  ;;  %v2409_v58 = vshll.u32 %v6710_v14, 16  ;;  %v2413_v16 = vshrl.u32 %v6710_v14, 16  ;;  %v5629_v46 = vld [vmem:[%s6779_s27 + $0x78] sm:$0xe] }
 0x10b   : > { %v8127_v45 = vsel %vm6953_vm6, %v4553_v35, %v4554_v9  ;;  %v8130_v42 = vrot.slane %v2368_v20, 4  ;;  %v2388_v23 = vsel %vm6818_vm3, %v2383_v30, %v7176_v34  ;;  %v2424_v18 = vshrl.u32 %v5358_v40, 16  ;;  %v5630_v35 = vld [vmem:[%s6779_s27 + $0x84] sm:$0xe]  ;;  %v6699_v30 = vld [vmem:[%s6779_s27 + $0xa8] sm:$0xff]  }
 0x10c   : > { %v5660_v12 = vcombine.low %v8115_v62, %v8127_v45  ;;  %v8137_v6 = vcombine.low %v2388_v23, %v2398_v57  ;;  %v2405_v50 = vrot.slane %v2403_v0, 5  ;;  %v8139_v60 = vrot.slane %v2409_v58, 5 }
 0x10d   : > { %v2415_v39 = vrot.slane %v2413_v16, 4  ;;  %v2419_v3 = vshll.u32 %v6711_v1, 16  ;;  %v2427_v47 = vshll.u32 %v5358_v40, 16  ;;  %v2426_v59 = vrot.slane %v2424_v18, 4 }
 0x10e   : > { %v2406_v34 = vor.u32 %v2405_v50, %v2402_v44  ;;  %v2433_v4 = vshll.u32 %v6712_v31, 16  ;;  %v2437_v57 = vshrl.u32 %v6712_v31, 16  ;;  %v5645_v9 = vrot.slane %v5629_v46, 9 }
 0x10f   : > { %6144 = vmatmul.mubr.msk.bf16.gmra.mrb[20].mxu1 %vm307_vm0, %v6697_v26  ;;  %v2416_v20 = vor.u32 %v2415_v39, %v8139_v60  ;;  %v2429_v37 = vrot.slane %v2427_v47, 5  ;;  %v4558_v33 = vrot.slane %v7831_v11, 5  ;;  %v2364_v40 = vsel %vm6818_vm3, %v8120_v19, %v8085_v29  ;;  %v5361_v19 = vld [vmem:[%s6779_s27 + $0x9c] sm:$0xf] }
 0x110   : > { %6147 = vmatprep.mubr.msk.bf16.mxu1 %vm307_vm0, %v6698_v28  ;;  %v2374_v26 = vsel %vm6818_vm3, %v8130_v42, %v8107_v49  ;;  %v2407_v11 = vrot.slane %v2406_v34, 4  ;;  %v4561_v29 = vrot.slane %v7834_v17, 5  ;;  %v6700_v28 = vld [vmem:[%s6779_s27 + $0xb4] sm:$0xff]   ;;  %v2421_v0 = vrot.slane %v2419_v3, 5  ;;  %v5364_v3 = vld [vmem:[%s6779_s27 + $0xa8] sm:$0xf] }
 0x111   : > { %6308 = vmatmul.mubr.msk.bf16.gmra.mrb[4].mxu0 %vm307_vm0, %v5656_v27  ;;  %v8165_v27 = vsel %vm6953_vm6, %v5645_v9, %v4558_v33  ;;  %v4560_v44 = vrot.slane %v4558_v33, 4  ;;  %v8170_v14 = vrot.slane %v2433_v4, 5  ;;  %v2439_v49 = vrot.slane %v2437_v57, 4  ;;  %v6713_v42 = vld [vmem:[%s6779_s27 + $0x98] sm:$0x1] }
 0x112   : > { %6311 = vmatprep.mubr.msk.bf16.mxu0 %vm307_vm0, %v5657_v51  ;;  %v5646_v58 = vrot.slane %v5630_v35, 9  ;;  %v2417_v55 = vrot.slane %v2416_v20, 4  ;;  %v2430_v15 = vor.u32 %v2429_v37, %v2426_v59  ;;  %v4565_v16 = vrot.slane %v7848_v8, 5  ;;  %v6714_v34 = vld [vmem:[%s6779_s27 + $0xa0] sm:$0xf] }
 0x113   : > { %v8174_v51 = vsel %vm6953_vm6, %v4560_v44, %v4561_v29  ;;  %v2443_v23 = vshll.u32 %v6713_v42, 16  ;;  %v4568_v18 = vrot.slane %v7851_v41, 5  ;;  %v2448_v50 = vshrl.u32 %v5361_v19, 16  ;;  %v6715_v44 = vld [vmem:[%s6779_s27 + $0xac] sm:$0xf] }
 0x114   : > { %v5661_v17 = vcombine.low %v8165_v27, %v8174_v51  ;;  %v2412_v39 = vsel %vm6818_vm3, %v2407_v11, %v8139_v60  ;;  %v8187_v46 = vsel %vm6953_vm6, %v5646_v58, %v4565_v16  ;;  %v4567_v1 = vrot.slane %v4565_v16, 4  ;;  %v5631_v29 = vld [vmem:[%s6779_s27 + $0x90] sm:$0xe]  ;;  %v6718_v27 = vld [vmem:[%s6779_s27 + $0xb8] sm:$0xf] }
 0x115   : > { %v2451_v8 = vshll.u32 %v5361_v19, 16  ;;  %v2440_v47 = vor.u32 %v2439_v49, %v8170_v14  ;;  %v2450_v41 = vrot.slane %v2448_v50, 4  ;;  %v2457_v59 = vshll.u32 %v6714_v34, 16 }
 0x116   : > { %v2461_v31 = vshrl.u32 %v6714_v34, 16  ;;  %v2422_v60 = vsel %vm6818_vm3, %v2417_v55, %v2421_v0  ;;  %v8195_v4 = vrot.slane %v2430_v15, 4  ;;  %v8199_v57 = vsel %vm6953_vm6, %v4567_v1, %v4568_v18  ;;  %v6716_v0 = vld [vmem:[%s6779_s27 + $0xa4] sm:$0x1] }
 0x117   : > { %6148 = vmatmul.mubr.msk.bf16.gmra.mrb[24].mxu1 %vm307_vm0, %v6699_v30  ;;  %v2453_v20 = vrot.slane %v2451_v8, 5  ;;  %v5662_v37 = vcombine.low %v8187_v46, %v8199_v57  ;;  %v8207_v9 = vrot.slane %v2457_v59, 5  ;;  %v2472_v35 = vshrl.u32 %v5364_v3, 16  ;;  %v6701_v30 = vld [vmem:[%s6779_s27 + $0xc0] sm:$0xff]   ;;  %v5367_v8 = vld [vmem:[%s6779_s27 + $0xb4] sm:$0xf] }
 0x118   : > { %6151 = vmatprep.mubr.msk.bf16.mxu1 %vm307_vm0, %v6700_v28  ;;  %v2463_v33 = vrot.slane %v2461_v31, 4  ;;  %v5381_v11 = vcombine.low %v2364_v40, %v2374_v26  ;;  %v2475_v38 = vshll.u32 %v5364_v3, 16  ;;  %v8216_v19 = vrot.slane %v2440_v47, 4  ;;  %v5632_v40 = vld [vmem:[%s6779_s27 + $0x9c] sm:$0xe] }
 0x119   : > { %6312 = vmatmul.mubr.msk.bf16.gmra.mrb[8].mxu0 %vm307_vm0, %v5658_v32  ;;  %v2454_v24 = vor.u32 %v2453_v20, %v2450_v41  ;;  %v2481_v32 = vshll.u32 %v6715_v44, 16  ;;  %v8218_v28 = vrot.slane %v2443_v23, 5  ;;  %v2467_v49 = vshll.u32 %v6716_v0, 16 }
 0x11a   : > { %6315 = vmatprep.mubr.msk.bf16.mxu0 %vm307_vm0, %v5659_v13  ;;  %v2485_v58 = vshrl.u32 %v6715_v44, 16  ;;  %v5383_v26 = vcombine.low %v2412_v39, %v2422_v60  ;;  %v2436_v56 = vsel %vm6818_vm3, %v8195_v4, %v8170_v14  ;;  %v2464_v10 = vor.u32 %v2463_v33, %v8207_v9  ;;  %v6717_v13 = vld [vmem:[%s6779_s27 + $0xb0] sm:$0x1]  ;;  %v6719_v44 = vld [vmem:[%s6779_s27 + $0xbc] sm:$0x1] }
 0x11b   : > { %v2491_v55 = vshll.u32 %v6717_v13, 16  ;;  %v8228_v15 = vrot.slane %v2454_v24, 4  ;;  %v2474_v16 = vrot.slane %v2472_v35, 4  ;;  %v2477_v42 = vrot.slane %v2475_v38, 5  ;;  %v6720_v13 = vld [vmem:[%s6779_s27 + $0xc4] sm:$0xf] }
 0x11c   : > { %v4572_v23 = vrot.slane %v7873_v54, 5  ;;  %v8232_v18 = vrot.slane %v2481_v32, 5  ;;  %v2487_v50 = vrot.slane %v2485_v58, 4  ;;  %v5647_v39 = vrot.slane %v5631_v29, 9 }
 0x11d   : > { %v5648_v1 = vrot.slane %v5632_v40, 9  ;;  %v2446_v3 = vsel %vm6818_vm3, %v8216_v19, %v8218_v28  ;;  %v2469_v47 = vrot.slane %v2467_v49, 5  ;;  %v4575_v54 = vrot.slane %v7879_v7, 5  ;;  %v5633_v49 = vld [vmem:[%s6779_s27 + $0xa8] sm:$0xe] }
 0x11e   : > { %v4574_v41 = vrot.slane %v4572_v23, 4  ;;  %v2465_v34 = vrot.slane %v2464_v10, 4  ;;  %v8241_v59 = vrot.slane %v2491_v55, 5  ;;  %v4579_v31 = vrot.slane %v7889_v52, 5 }
 0x11f   : > { %6152 = vmatmul.mubr.msk.bf16.gmra.mrb[28].mxu1 %vm307_vm0, %v6701_v30  ;;  %v4582_v60 = vrot.slane %v7899_v61, 5  ;;  %v2460_v20 = vsel %vm6818_vm3, %v8228_v15, %v8207_v9  ;;  %v2478_v33 = vor.u32 %v2477_v42, %v2474_v16  ;;  %v2496_v7 = vshrl.u32 %v5367_v8, 16 }
 0x120   : > { %6175 = vmatprep.mubr.msk.bf16.mxu1 %vm307_vm0, %v5381_v11  ;;  %v2499_v35 = vshll.u32 %v5367_v8, 16  ;;  %v2488_v52 = vor.u32 %v2487_v50, %v8232_v18  ;;  %v4573_v61 = vsel %vm6953_vm6, %v5647_v39, %v4572_v23  ;;  %v8262_v62 = vsel %vm6953_vm6, %v5648_v1, %v4579_v31 }
 0x121   : > { %6316 = vmatmul.mubr.msk.bf16.gmra.mrb[12].mxu0 %vm307_vm0, %v5660_v12  ;;  %v4581_v45 = vrot.slane %v4579_v31, 4  ;;  %v5370_v12 = vld [vmem:[%s6779_s27 + $0xc0] sm:$0xf]  ;;  %v4576_v9 = vsel %vm6953_vm6, %v4574_v41, %v4575_v54  ;;  %v2498_v30 = vrot.slane %v2496_v7, 4  ;;  %v2505_v51 = vshll.u32 %v6718_v27, 16 }
 0x122   : > { %6319 = vmatprep.mubr.msk.bf16.mxu0 %vm307_vm0, %v5661_v17  ;;  %v2501_v11 = vrot.slane %v2499_v35, 5  ;;  %v2470_v17 = vsel %vm6818_vm3, %v2465_v34, %v2469_v47  ;;  %v2509_v38 = vshrl.u32 %v6718_v27, 16  ;;  %v2515_v32 = vshll.u32 %v6719_v44, 16  ;;  %v5636_v7 = vld [vmem:[%s6779_s27 + $0xcc] sm:$0xe] }
 0x123   : > { %v8272_v24 = vsel %vm6953_vm6, %v4581_v45, %v4582_v60  ;;  %v2507_v28 = vrot.slane %v2505_v51, 5  ;;  %v2520_v0 = vshrl.u32 %v5370_v12, 16  ;;  %v5663_v58 = vcombine.low %v4573_v61, %v4576_v9 }
 0x124   : > { %v5664_v29 = vcombine.low %v8262_v62, %v8272_v24  ;;  %v2502_v19 = vor.u32 %v2501_v11, %v2498_v30  ;;  %v2511_v40 = vrot.slane %v2509_v38, 4  ;;  %v2523_v10 = vshll.u32 %v5370_v12, 16 }
 0x125   : > { %v2529_v55 = vshll.u32 %v6720_v13, 16  ;;  %v2479_v15 = vrot.slane %v2478_v33, 4  ;;  %v2489_v16 = vrot.slane %v2488_v52, 4  ;;  %v2533_v23 = vshrl.u32 %v6720_v13, 16  ;;  %v5635_v33 = vld [vmem:[%s6779_s27 + $0xc0] sm:$0xe] }
 0x126   : > { %v2503_v42 = vrot.slane %v2502_v19, 4  ;;  %v2512_v50 = vor.u32 %v2511_v40, %v2507_v28  ;;  %v2522_v39 = vrot.slane %v2520_v0, 4  ;;  %v2525_v1 = vrot.slane %v2523_v10, 5 }
 0x127   : > { %6176 = vmatmul.mubr.msk.bf16.vlgmr.msra.gmra.mrb[16].mxu1 %vm307_vm0, %v8137_v6  ;;  %v5649_v8 = vrot.slane %v5633_v49, 9  ;;  %v2517_v6 = vrot.slane %v2515_v32, 5  ;;  %v2531_v47 = vrot.slane %v2529_v55, 5  ;;  %v2535_v41 = vrot.slane %v2533_v23, 4 }
 0x128   : > { %6179 = vmatprep.mubr.msk.bf16.mxu1 %vm307_vm0, %v5383_v26  ;;  %v4586_v26 = vrot.slane %v7908_v25, 5  ;;  %v5384_v54 = vcombine.low %v2436_v56, %v2446_v3  ;;  %v5385_v34 = vcombine.low %v2460_v20, %v2470_v17  ;;  %v2513_v46 = vrot.slane %v2512_v50, 4 }
 0x129   : > { %6320 = vmatmul.mubr.msk.bf16.gmra.mrb[16].mxu0 %vm307_vm0, %v5662_v37  ;;  %v4589_v57 = vrot.slane %v7917_v5, 5  ;;  %v5634_v37 = vld [vmem:[%s6779_s27 + $0xb4] sm:$0xe]  ;;  %v2484_v31 = vsel %vm6818_vm3, %v2479_v15, %v8232_v18  ;;  %v4593_v14 = vrot.slane %v7925_v22, 5  ;;  %v2494_v4 = vsel %vm6818_vm3, %v2489_v16, %v8241_v59  ;;  %v6721_v5 = vld [vmem:[%s6779_s27 + $0xc8] sm:$0x1] }
 0x12a   : > { %6323 = vmatprep.mubr.msk.bf16.mxu0 %vm307_vm0, %v5663_v58  ;;  %v4587_v25 = vsel %vm6953_vm6, %v5649_v8, %v4586_v26  ;;  %v4588_v60 = vrot.slane %v4586_v26, 4  ;;  %v2508_v56 = vsel %vm6818_vm3, %v2503_v42, %v2507_v28  ;;  %v2526_v3 = vor.u32 %v2525_v1, %v2522_v39 }
 0x12b   : > { %v2539_v20 = vshll.u32 %v6721_v5, 16  ;;  %v2518_v18 = vsel %vm6818_vm3, %v2513_v46, %v2517_v6  ;;  %v2536_v35 = vor.u32 %v2535_v41, %v2531_v47  ;;  %v5650_v22 = vrot.slane %v5634_v37, 9 }
 0x12c   : > { %v4590_v52 = vsel %vm6953_vm6, %v4588_v60, %v4589_v57  ;;  %v4595_v59 = vrot.slane %v4593_v14, 4  ;;  %v4596_v62 = vrot.slane %v7936_v48, 5  ;;  %v4600_v45 = vrot.slane %v7945_v2, 5 }
 0x12d   : > { %v5665_v61 = vcombine.low %v4587_v25, %v4590_v52  ;;  %v5651_v12 = vrot.slane %v5635_v33, 9  ;;  %v4603_v9 = vrot.slane %v7955_v43, 5  ;;  %v5652_v30 = vrot.slane %v5636_v7, 9 }
 0x12e   : > { %v4607_v11 = vrot.slane %v7964_v63, 5  ;;  %v5386_v27 = vcombine.low %v2484_v31, %v2494_v4  ;;  %v4602_v51 = vrot.slane %v4600_v45, 4  ;;  %v2541_v17 = vrot.slane %v2539_v20, 5 }
 0x12f   : > { %6180 = vmatmul.mubr.msk.bf16.gmra.mrb[20].mxu1 %vm307_vm0, %v5384_v54  ;;  %v4610_v48 = vrot.slane %v7971_v53, 5  ;;  %v5387_v2 = vcombine.low %v2508_v56, %v2518_v18  ;;  %v2527_v44 = vrot.slane %v2526_v3, 4  ;;  %v4594_v43 = vsel %vm6953_vm6, %v5650_v22, %v4593_v14  ;;  %v8347_v54 = vld [vmem:[%s8408_s2] ss:$0 sm:$0xff] }
 0x130   : > { %6183 = vmatprep.mubr.msk.bf16.mxu1 %vm307_vm0, %v5385_v34  ;;  %v4608_v24 = vsel %vm6953_vm6, %v5652_v30, %v4607_v11  ;;  %v4609_v38 = vrot.slane %v4607_v11, 4  ;;  %v4597_v63 = vsel %vm6953_vm6, %v4595_v59, %v4596_v62  ;;  %v2537_v32 = vrot.slane %v2536_v35, 4 }
 0x131   : > { %6324 = vmatmul.mubr.msk.bf16.gmra.mrb[20].mxu0 %vm307_vm0, %v5664_v29  ;;  %v4601_v29 = vsel %vm6953_vm6, %v5651_v12, %v4600_v45  ;;  %v4604_v19 = vsel %vm6953_vm6, %v4602_v51, %v4603_v9  ;;  %v5666_v0 = vcombine.low %v4594_v43, %v4597_v63  ;;  %v2532_v58 = vsel %vm6818_vm3, %v2527_v44, %v2531_v47 }
 0x132   : > { %6327 = vmatprep.mubr.msk.bf16.mxu0 %vm307_vm0, %v5665_v61  ;;  %v4611_v53 = vsel %vm6953_vm6, %v4609_v38, %v4610_v48  ;;  %v5667_v49 = vcombine.low %v4601_v29, %v4604_v19  ;;  %v2542_v40 = vsel %vm6818_vm3, %v2537_v32, %v2541_v17 }
 0x133   : > { %v5668_v28 = vcombine.low %v4608_v24, %v4611_v53  ;;  %v5388_v10 = vcombine.low %v2532_v58, %v2542_v40 }
 0x137   : > { %6184 = vmatmul.mubr.msk.bf16.gmra.mrb[24].mxu1 %vm307_vm0, %v5386_v27 }
 0x138   : > { %6187 = vmatprep.mubr.msk.bf16.mxu1 %vm307_vm0, %v5387_v2 }
 0x139   : > { %6328 = vmatmul.mubr.msk.bf16.gmra.mrb[24].mxu0 %vm307_vm0, %v5666_v0 }
 0x13a   : > { %6331 = vmatprep.mubr.msk.bf16.mxu0 %vm307_vm0, %v5667_v49 }
 0x13f   : > { %6188 = vmatmul.mubr.msk.bf16.gmra.mrb[28].mxu1 %vm307_vm0, %v5388_v10 }
 0x141   : > { %6332 = vmatmul.mubr.msk.bf16.gmra.mrb[28].mxu0 %vm307_vm0, %v5668_v28 }
 0x1ba   : > { %v6125_v21 = vpop.f32.mrb[0].mxu1 }
 0x1bb   : > { %v1952_v13 = vpop.f32.mrb[1].mxu1  ;;  %v6339_v34 = vadd.f32 %v6125_v21, %v8347_v54 }
 0x1bc   : > { %v6126_v55 = vpop.f32.mrb[2].mxu1  ;;  %v6341_v46 = vadd.f32 %v8347_v54, %v1952_v13 }
 0x1bd   : > { %v1955_v15 = vpop.f32.mrb[3].mxu1  ;;  %v6343_v37 = vadd.f32 %v6126_v55, %v8347_v54 }
 0x1be   : > { %v6345_v60 = vadd.f32 %v8347_v54, %v1955_v15 }
 0x1c2   : > { %v6129_v16 = vpop.f32.mrb[4].mxu1 }
 0x1c3   : > { %v1968_v42 = vpop.f32.mrb[5].mxu1  ;;  %v6347_v7 = vadd.f32 %v6129_v16, %v8347_v54 }
 0x1c4   : > { %v6130_v23 = vpop.f32.mrb[6].mxu1  ;;  %v6349_v18 = vadd.f32 %v8347_v54, %v1968_v42 }
 0x1c5   : > { %v1971_v50 = vpop.f32.mrb[7].mxu1  ;;  %v6351_v52 = vadd.f32 %v6130_v23, %v8347_v54 }
 0x1c6   : > { %v6353_v59 = vadd.f32 %v8347_v54, %v1971_v50 }
 0x1ca   : > { %v6133_v36 = vpop.f32.mrb[8].mxu1 }
 0x1cb   : > { %v1984_v39 = vpop.f32.mrb[9].mxu1  ;;  %v6355_v51 = vadd.f32 %v6133_v36, %v8347_v54 }
 0x1cc   : > { %v6134_v1 = vpop.f32.mrb[10].mxu1  ;;  %v6357_v17 = vadd.f32 %v8347_v54, %v1984_v39 }
 0x1cd   : > { %v1987_v8 = vpop.f32.mrb[11].mxu1  ;;  %v6359_v38 = vadd.f32 %v6134_v1, %v8347_v54 }
 0x1ce   : > { %v6361_v44 = vadd.f32 %v8347_v54, %v1987_v8 }
 0x1d2   : > { %v6137_v6 = vpop.f32.mrb[12].mxu1 }
 0x1d3   : > { %v2000_v47 = vpop.f32.mrb[13].mxu1  ;;  %v6363_v0 = vadd.f32 %v6137_v6, %v8347_v54 }
 0x1d4   : > { %v6138_v41 = vpop.f32.mrb[14].mxu1  ;;  %v6365_v49 = vadd.f32 %v8347_v54, %v2000_v47 }
 0x1d5   : > { %v2003_v26 = vpop.f32.mrb[15].mxu1  ;;  %v6367_v40 = vadd.f32 %v6138_v41, %v8347_v54 }
 0x1d6   : > { %v6369_v13 = vadd.f32 %v8347_v54, %v2003_v26 }
 0x1dc   : > { %v6305_v57 = vpop.f32.mrb[0].mxu0 }
 0x1dd   : > { %v6340_v31 = vadd.f32 %v6339_v34, %v6305_v57  ;;  %v4758_v25 = vpop.f32.mrb[1].mxu0 }
 0x1de   : > { %v6342_v14 = vadd.f32 %v6341_v46, %v4758_v25  ;;  %v6306_v4 = vpop.f32.mrb[2].mxu0 }
 0x1df   : > { %v6344_v56 = vadd.f32 %v6343_v37, %v6306_v4  ;;  %v4761_v3 = vpop.f32.mrb[3].mxu0 }
 0x1e0   : > { %v6346_v5 = vadd.f32 %v6345_v60, %v4761_v3 }
 0x1e1   : > { %v5762_v20 = vpack.c.bf16 %v6344_v56, %v6340_v31 }
 0x1e2   : > { %v5757_v33 = vpack.c.bf16 %v6346_v5, %v6342_v14 }
 0x1e3   : > { %5834 = vst [vmem:[%s8357_s11 + $0x8] sm:$0xff] %v5762_v20  }
 0x1e4   : > { %5758 = vst [vmem:[%s8357_s11] sm:$0xff] %v5757_v33   ;;  %v6309_v35 = vpop.f32.mrb[4].mxu0 }
 0x1e5   : > { %v6348_v22 = vadd.f32 %v6347_v7, %v6309_v35  ;;  %v4774_v61 = vpop.f32.mrb[5].mxu0 }
 0x1e6   : > { %v6350_v62 = vadd.f32 %v6349_v18, %v4774_v61  ;;  %v6310_v45 = vpop.f32.mrb[6].mxu0 }
 0x1e7   : > { %v6352_v12 = vadd.f32 %v6351_v52, %v6310_v45  ;;  %v4777_v9 = vpop.f32.mrb[7].mxu0 }
 0x1e8   : > { %v6354_v30 = vadd.f32 %v6353_v59, %v4777_v9 }
 0x1e9   : > { %v5772_v11 = vpack.c.bf16 %v6352_v12, %v6348_v22 }
 0x1ea   : > { %v5767_v27 = vpack.c.bf16 %v6354_v30, %v6350_v62 }
 0x1eb   : > { %5836 = vst [vmem:[%s8357_s11 + $0x18] sm:$0xff] %v5772_v11  }
 0x1ec   : > { %5835 = vst [vmem:[%s8357_s11 + $0x10] sm:$0xff] %v5767_v27   ;;  %v6313_v24 = vpop.f32.mrb[8].mxu0 }
 0x1ed   : > { %v6356_v48 = vadd.f32 %v6355_v51, %v6313_v24  ;;  %v4790_v2 = vpop.f32.mrb[9].mxu0 }
 0x1ee   : > { %v6358_v43 = vadd.f32 %v6357_v17, %v4790_v2  ;;  %v6314_v63 = vpop.f32.mrb[10].mxu0 }
 0x1ef   : > { %v6360_v32 = vadd.f32 %v6359_v38, %v6314_v63  ;;  %v4793_v29 = vpop.f32.mrb[11].mxu0 }
 0x1f0   : > { %v6362_v19 = vadd.f32 %v6361_v44, %v4793_v29 }
 0x1f1   : > { %v5782_v53 = vpack.c.bf16 %v6360_v32, %v6356_v48 }
 0x1f2   : > { %v5777_v28 = vpack.c.bf16 %v6362_v19, %v6358_v43 }
 0x1f3   : > { %5838 = vst [vmem:[%s8357_s11 + $0x28] sm:$0xff] %v5782_v53  }
 0x1f4   : > { %5837 = vst [vmem:[%s8357_s11 + $0x20] sm:$0xff] %v5777_v28   ;;  %v6317_v58 = vpop.f32.mrb[12].mxu0 }
 0x1f5   : > { %v6364_v10 = vadd.f32 %v6363_v0, %v6317_v58  ;;  %v4806_v21 = vpop.f32.mrb[13].mxu0 }
 0x1f6   : > { %v6366_v55 = vadd.f32 %v6365_v49, %v4806_v21  ;;  %v6318_v15 = vpop.f32.mrb[14].mxu0 }
 0x1f7   : > { %v6368_v16 = vadd.f32 %v6367_v40, %v6318_v15  ;;  %v4809_v42 = vpop.f32.mrb[15].mxu0 }
 0x1f8   : > { %v6370_v23 = vadd.f32 %v6369_v13, %v4809_v42 }
 0x1f9   : > { %v5792_v36 = vpack.c.bf16 %v6368_v16, %v6364_v10 }
 0x1fa   : > { %v6177_v50 = vpop.f32.mrb[16].mxu1  ;;  %v5787_v1 = vpack.c.bf16 %v6370_v23, %v6366_v55 }
 0x1fb   : > { %v2753_v39 = vpop.f32.mrb[17].mxu1  ;;  %v6371_v8 = vadd.f32 %v6177_v50, %v8347_v54  ;;  %5840 = vst [vmem:[%s8357_s11 + $0x38] sm:$0xff] %v5792_v36  }
 0x1fc   : > { %v6178_v6 = vpop.f32.mrb[18].mxu1  ;;  %v6373_v47 = vadd.f32 %v8347_v54, %v2753_v39  ;;  %5839 = vst [vmem:[%s8357_s11 + $0x30] sm:$0xff] %v5787_v1   ;;  %v6321_v34 = vpop.f32.mrb[16].mxu0 }
 0x1fd   : > { %v2756_v41 = vpop.f32.mrb[19].mxu1  ;;  %v6375_v26 = vadd.f32 %v6178_v6, %v8347_v54  ;;  %v6372_v46 = vadd.f32 %v6371_v8, %v6321_v34  ;;  %v4822_v57 = vpop.f32.mrb[17].mxu0 }
 0x1fe   : > { %v6377_v37 = vadd.f32 %v8347_v54, %v2756_v41  ;;  %v6374_v31 = vadd.f32 %v6373_v47, %v4822_v57  ;;  %v6322_v25 = vpop.f32.mrb[18].mxu0 }
 0x1ff   : > { %v6376_v60 = vadd.f32 %v6375_v26, %v6322_v25  ;;  %v4825_v14 = vpop.f32.mrb[19].mxu0 }
 0x200   : > { %v6378_v4 = vadd.f32 %v6377_v37, %v4825_v14 }
 0x201   : > { %v5802_v3 = vpack.c.bf16 %v6376_v60, %v6372_v46 }
 0x202   : > { %v6181_v56 = vpop.f32.mrb[20].mxu1  ;;  %v5797_v20 = vpack.c.bf16 %v6378_v4, %v6374_v31 }
 0x203   : > { %v2769_v5 = vpop.f32.mrb[21].mxu1  ;;  %v6379_v33 = vadd.f32 %v6181_v56, %v8347_v54  ;;  %5842 = vst [vmem:[%s8357_s11 + $0x48] sm:$0xff] %v5802_v3  }
 0x204   : > { %v6182_v7 = vpop.f32.mrb[22].mxu1  ;;  %v6381_v18 = vadd.f32 %v8347_v54, %v2769_v5  ;;  %5841 = vst [vmem:[%s8357_s11 + $0x40] sm:$0xff] %v5797_v20   ;;  %v6325_v52 = vpop.f32.mrb[20].mxu0 }
 0x205   : > { %v2772_v35 = vpop.f32.mrb[23].mxu1  ;;  %v6383_v22 = vadd.f32 %v6182_v7, %v8347_v54  ;;  %v6380_v61 = vadd.f32 %v6379_v33, %v6325_v52  ;;  %v4838_v59 = vpop.f32.mrb[21].mxu0 }
 0x206   : > { %v6385_v62 = vadd.f32 %v8347_v54, %v2772_v35  ;;  %v6382_v45 = vadd.f32 %v6381_v18, %v4838_v59  ;;  %v6326_v12 = vpop.f32.mrb[22].mxu0 }
 0x207   : > { %v6384_v9 = vadd.f32 %v6383_v22, %v6326_v12  ;;  %v4841_v30 = vpop.f32.mrb[23].mxu0 }
 0x208   : > { %v6386_v11 = vadd.f32 %v6385_v62, %v4841_v30 }
 0x209   : > { %v5812_v51 = vpack.c.bf16 %v6384_v9, %v6380_v61 }
 0x20a   : > { %v6185_v27 = vpop.f32.mrb[24].mxu1  ;;  %v5807_v24 = vpack.c.bf16 %v6386_v11, %v6382_v45 }
 0x20b   : > { %v2785_v17 = vpop.f32.mrb[25].mxu1  ;;  %v6387_v38 = vadd.f32 %v6185_v27, %v8347_v54  ;;  %5844 = vst [vmem:[%s8357_s11 + $0x58] sm:$0xff] %v5812_v51  }
 0x20c   : > { %v6186_v48 = vpop.f32.mrb[26].mxu1  ;;  %v6389_v2 = vadd.f32 %v8347_v54, %v2785_v17  ;;  %5843 = vst [vmem:[%s8357_s11 + $0x50] sm:$0xff] %v5807_v24   ;;  %v6329_v43 = vpop.f32.mrb[24].mxu0 }
 0x20d   : > { %v2788_v44 = vpop.f32.mrb[27].mxu1  ;;  %v6391_v63 = vadd.f32 %v6186_v48, %v8347_v54  ;;  %v6388_v32 = vadd.f32 %v6387_v38, %v6329_v43  ;;  %v4854_v29 = vpop.f32.mrb[25].mxu0 }
 0x20e   : > { %v6393_v19 = vadd.f32 %v8347_v54, %v2788_v44  ;;  %v6390_v53 = vadd.f32 %v6389_v2, %v4854_v29  ;;  %v6330_v28 = vpop.f32.mrb[26].mxu0 }
 0x20f   : > { %v6392_v0 = vadd.f32 %v6391_v63, %v6330_v28  ;;  %v4857_v49 = vpop.f32.mrb[27].mxu0 }
 0x210   : > { %v6394_v58 = vadd.f32 %v6393_v19, %v4857_v49 }
 0x211   : > { %v5822_v10 = vpack.c.bf16 %v6392_v0, %v6388_v32 }
 0x212   : > { %v6189_v40 = vpop.f32.mrb[28].mxu1  ;;  %v5817_v13 = vpack.c.bf16 %v6394_v58, %v6390_v53 }
 0x213   : > { %v2801_v21 = vpop.f32.mrb[29].mxu1  ;;  %v6395_v55 = vadd.f32 %v6189_v40, %v8347_v54  ;;  %5846 = vst [vmem:[%s8357_s11 + $0x68] sm:$0xff] %v5822_v10  }
 0x214   : > { %v6190_v15 = vpop.f32.mrb[30].mxu1  ;;  %v6397_v16 = vadd.f32 %v8347_v54, %v2801_v21  ;;  %5845 = vst [vmem:[%s8357_s11 + $0x60] sm:$0xff] %v5817_v13   ;;  %v6333_v23 = vpop.f32.mrb[28].mxu0 }
 0x215   : > { %v2804_v42 = vpop.f32.mrb[31].mxu1  ;;  %v6399_v50 = vadd.f32 %v6190_v15, %v8347_v54  ;;  %v6396_v36 = vadd.f32 %v6395_v55, %v6333_v23  ;;  %v4870_v39 = vpop.f32.mrb[29].mxu0 }
 0x216   : > { %v6401_v1 = vadd.f32 %v8347_v54, %v2804_v42  ;;  %v6398_v8 = vadd.f32 %v6397_v16, %v4870_v39  ;;  %v6334_v6 = vpop.f32.mrb[30].mxu0 }
 0x217   : > { %v6400_v47 = vadd.f32 %v6399_v50, %v6334_v6  ;;  %v4873_v41 = vpop.f32.mrb[31].mxu0 }
 0x218   : > { %v6402_v34 = vadd.f32 %v6401_v1, %v4873_v41 }
 0x219   : > { %v5832_v26 = vpack.c.bf16 %v6400_v47, %v6396_v36 }
 0x21a   : > { %v5827_v46 = vpack.c.bf16 %v6402_v34, %v6398_v8 }
 0x21b   : > { %5848 = vst [vmem:[%s8357_s11 + $0x78] sm:$0xff] %v5832_v26  }
 0x21c   : > { %5847 = vst [vmem:[%s8357_s11 + $0x70] sm:$0xff] %v5827_v46  }
 0x21d PF: > { %s13_s12 = sadd.s32 1, %s6728_s12  }
 0x21e   : > { %p10_p4 = scmp.ge.s32.totalorder %s13_s12, 4  }
 0x220   :  { %12 = sbr.rel (!%p10_p4) target bundleno = 1 (0x1), region = 64 }

</bundles_post_ra>
